<compile_context>
chip_gen: v6e
topology: v6e:2x2x1
jax: 0.10.0
libtpu: 0.0.40
codegen_flags: <defaults>
</compile_context>

<pallas_src>
import jax
import jax.numpy as jnp
from jax.experimental import pallas as pl
from jax.experimental.pallas import tpu as pltpu

LANE = 128          # TPU lane width (final output padded to a multiple of this)
SUBLANE = 8         # TPU sublane granularity (batch tile must be a multiple)


def qn_kernel(x_ref,
              w1_ref, b1_ref,
              w2_ref, b2_ref,
              w3_ref, b3_ref,
              w4_ref, b4_ref,
              w5_ref, b5_ref,
              o_ref):
    """One batch tile: 4x (matmul + bias + relu) + final matmul + bias.

    Weights arrive in bf16; dot products accumulate in f32 on the MXU; biases
    and inter-layer activations are kept in f32.
    """
    h = x_ref[...].astype(jnp.float32)

    def dense(h, w_ref, b_ref, relu):
        # bf16 x bf16 -> f32 accumulation on the MXU; bias broadcast along
        # sublanes is free on the VPU (no explicit broadcast_to needed).
        y = jnp.dot(h.astype(jnp.bfloat16), w_ref[...],
                    preferred_element_type=jnp.float32) + b_ref[...]
        return jnp.maximum(y, 0.0) if relu else y

    h = dense(h, w1_ref, b1_ref, relu=True)
    h = dense(h, w2_ref, b2_ref, relu=True)
    h = dense(h, w3_ref, b3_ref, relu=True)
    h = dense(h, w4_ref, b4_ref, relu=True)
    y = dense(h, w5_ref, b5_ref, relu=False)   # lane-dense padded output

    o_ref[...] = y.astype(o_ref.dtype)


def _round_up(x, m):
    return ((x + m - 1) // m) * m


def qn_forward(x, params, *, tile_b=256):
    """Forward pass of QN.

    x:      (batch, state_number) f32
    params: list of 5 (W, b) pairs, W shaped (in, out), b shaped (1, out).
    Returns (batch, action_number) f32.
    """
    batch, state_number = x.shape
    action_number = params[-1][0].shape[1]

    # ---- prepare kernel-side params: bf16 weights, lane-dense padded last layer.
    out_padded = _round_up(action_number, LANE)
    kparams = []
    for li, (w, b) in enumerate(params):
        w = w.astype(jnp.bfloat16)
        b = b.astype(jnp.float32)
        if li == len(params) - 1 and w.shape[1] != out_padded:
            w = jnp.pad(w, ((0, 0), (0, out_padded - w.shape[1])))
            b = jnp.pad(b, ((0, 0), (0, out_padded - b.shape[1])))
        kparams.append((w, b))

    # ---- batch tiling (pad batch to a multiple of the tile).
    tile_b = max(SUBLANE, min(tile_b, _round_up(batch, SUBLANE)))
    padded_batch = _round_up(batch, tile_b)
    if padded_batch != batch:
        x = jnp.pad(x, ((0, padded_batch - batch), (0, 0)))
    grid = (padded_batch // tile_b,)

    # ---- specs: x / out tiled over batch; weights & biases whole + resident.
    const_map = lambda i: (0, 0)
    in_specs = [pl.BlockSpec((tile_b, state_number), lambda i: (i, 0))]
    flat = []
    for w, b in kparams:
        in_specs.append(pl.BlockSpec(w.shape, const_map))
        in_specs.append(pl.BlockSpec(b.shape, const_map))
        flat.extend([w, b])
    out_specs = pl.BlockSpec((tile_b, out_padded), lambda i: (i, 0))

    # ---- advisory cost estimate for the XLA scheduler.
    layer_dims = [(w.shape[0], w.shape[1]) for w, _ in kparams]
    flops = 2 * padded_batch * sum(fi * fo for fi, fo in layer_dims)
    bytes_accessed = (
        x.size * x.dtype.itemsize
        + sum(a.size * a.dtype.itemsize for a in flat)
        + padded_batch * out_padded * 4
    )

    out = pl.pallas_call(
        qn_kernel,
        out_shape=jax.ShapeDtypeStruct((padded_batch, out_padded), jnp.float32),
        grid=grid,
        in_specs=in_specs,
        out_specs=out_specs,
        compiler_params=pltpu.CompilerParams(
            dimension_semantics=("parallel",),      # 2 TCs on v7x
            vmem_limit_bytes=32 * 1024 * 1024,      # headroom above v5e default
        ),
        cost_estimate=pl.CostEstimate(
            flops=flops, transcendentals=0, bytes_accessed=bytes_accessed),
    )(x, *flat)

    # Slice away batch padding and the lane padding of the final layer.
    return out[:batch, :action_number]


def init_qn_params(key, state_number, hidlyr_nodes, action_number):
    """PyTorch-Linear-style init: U(-1/sqrt(fan_in), 1/sqrt(fan_in))."""
    dims = [
        (state_number, hidlyr_nodes),          # fc1
        (hidlyr_nodes, hidlyr_nodes * 2),      # fc2
        (hidlyr_nodes * 2, hidlyr_nodes * 4),  # fc3
        (hidlyr_nodes * 4, hidlyr_nodes * 8),  # fc4
        (hidlyr_nodes * 8, action_number),     # out
    ]
    params = []
    for (fan_in, fan_out) in dims:
        key, kw, kb = jax.random.split(key, 3)
        bound = 1.0 / jnp.sqrt(jnp.float32(fan_in))
        w = jax.random.uniform(kw, (fan_in, fan_out), jnp.float32, -bound, bound)
        b = jax.random.uniform(kb, (1, fan_out), jnp.float32, -bound, bound)
        params.append((w, b))
    return params


def qn_reference(x, params):
    """Pure-JAX reference mirroring the kernel's precision (bf16 operands,
    f32 accumulation / bias / ReLU)."""
    h = x.astype(jnp.float32)
    n = len(params)
    for i, (w, b) in enumerate(params):
        h = jnp.dot(h.astype(jnp.bfloat16), w.astype(jnp.bfloat16),
                    preferred_element_type=jnp.float32) + b.astype(jnp.float32)
        if i < n - 1:
            h = jnp.maximum(h, 0.0)
    return h


if __name__ == "__main__":
    # Small shapes consistent with the module's forward; batch chosen so the
    # grid has >1 step and exercises batch padding (300 -> 512, 2 tiles of 256).
    batch = 300
    state_number = 16
    hidlyr_nodes = 32
    action_number = 4

    key = jax.random.PRNGKey(0)
    key, kx = jax.random.split(key)
    x = jax.random.normal(kx, (batch, state_number), jnp.float32)

    params = init_qn_params(key, state_number, hidlyr_nodes, action_number)

    out = qn_forward(x, params, tile_b=256)
    out = jax.block_until_ready(out)

    ref = qn_reference(x, params)
    assert out.shape == (batch, action_number)
    assert jnp.allclose(out, ref, atol=2e-3, rtol=2e-2), (
        float(jnp.max(jnp.abs(out - ref))))

    print("KERNEL_OK")
</pallas_src>

<mosaic_0001>
module attributes {stable_mosaic.version = 11 : i64} {
  func.func @qn_kernel(%arg0: i32, %arg1: memref<256x16xf32, #tpu.memory_space<vmem>>, %arg2: memref<16x32xbf16, #tpu.memory_space<vmem>>, %arg3: memref<1x32xf32, #tpu.memory_space<vmem>>, %arg4: memref<32x64xbf16, #tpu.memory_space<vmem>>, %arg5: memref<1x64xf32, #tpu.memory_space<vmem>>, %arg6: memref<64x128xbf16, #tpu.memory_space<vmem>>, %arg7: memref<1x128xf32, #tpu.memory_space<vmem>>, %arg8: memref<128x256xbf16, #tpu.memory_space<vmem>>, %arg9: memref<1x256xf32, #tpu.memory_space<vmem>>, %arg10: memref<256x128xbf16, #tpu.memory_space<vmem>>, %arg11: memref<1x128xf32, #tpu.memory_space<vmem>>, %arg12: memref<256x128xf32, #tpu.memory_space<vmem>>) attributes {dimension_semantics = [#tpu.dimension_semantics<parallel>], iteration_bounds = array<i64: 2>, scalar_prefetch = 0 : i64, scratch_operands = 0 : i64, tpu.core_type = #tpu.core_type<tc>, window_params = [{transform_indices = @transform_0, window_bounds = array<i64: 256, 16>}, {pipeline_mode = #tpu.pipeline_mode<synchronous>, transform_indices = @transform_1, window_bounds = array<i64: 16, 32>}, {pipeline_mode = #tpu.pipeline_mode<synchronous>, transform_indices = @transform_2, window_bounds = array<i64: 1, 32>}, {pipeline_mode = #tpu.pipeline_mode<synchronous>, transform_indices = @transform_3, window_bounds = array<i64: 32, 64>}, {pipeline_mode = #tpu.pipeline_mode<synchronous>, transform_indices = @transform_4, window_bounds = array<i64: 1, 64>}, {pipeline_mode = #tpu.pipeline_mode<synchronous>, transform_indices = @transform_5, window_bounds = array<i64: 64, 128>}, {pipeline_mode = #tpu.pipeline_mode<synchronous>, transform_indices = @transform_6, window_bounds = array<i64: 1, 128>}, {pipeline_mode = #tpu.pipeline_mode<synchronous>, transform_indices = @transform_7, window_bounds = array<i64: 128, 256>}, {pipeline_mode = #tpu.pipeline_mode<synchronous>, transform_indices = @transform_8, window_bounds = array<i64: 1, 256>}, {pipeline_mode = #tpu.pipeline_mode<synchronous>, transform_indices = @transform_9, window_bounds = array<i64: 256, 128>}, {pipeline_mode = #tpu.pipeline_mode<synchronous>, transform_indices = @transform_10, window_bounds = array<i64: 1, 128>}, {transform_indices = @transform_11, window_bounds = array<i64: 256, 128>}]} {
    %c0 = arith.constant 0 : index
    %c0_0 = arith.constant 0 : index
    %0 = vector.load %arg1[%c0, %c0_0] : memref<256x16xf32, #tpu.memory_space<vmem>>, vector<256x16xf32>
    %1 = arith.truncf %0 : vector<256x16xf32> to vector<256x16xbf16>
    %c0_1 = arith.constant 0 : index
    %c0_2 = arith.constant 0 : index
    %2 = vector.load %arg2[%c0_1, %c0_2] : memref<16x32xbf16, #tpu.memory_space<vmem>>, vector<16x32xbf16>
    %cst = arith.constant dense<0.000000e+00> : vector<256x32xf32>
    %3 = tpu.matmul %1, %2, %cst {dimension_numbers = #tpu.dot_dimension_numbers<[1], [0], [0], [1], [0, 0, 1, 1], [], []>} : vector<256x16xbf16>, vector<16x32xbf16>, vector<256x32xf32> -> vector<256x32xf32>
    %c0_3 = arith.constant 0 : index
    %c0_4 = arith.constant 0 : index
    %4 = vector.load %arg3[%c0_3, %c0_4] : memref<1x32xf32, #tpu.memory_space<vmem>>, vector<1x32xf32>
    %5 = vector.broadcast %4 : vector<1x32xf32> to vector<256x32xf32>
    %6 = arith.addf %3, %5 : vector<256x32xf32>
    %cst_5 = arith.constant 0.000000e+00 : f32
    %7 = vector.broadcast %cst_5 : f32 to vector<256x32xf32>
    %8 = arith.maximumf %6, %7 : vector<256x32xf32>
    %9 = arith.truncf %8 : vector<256x32xf32> to vector<256x32xbf16>
    %c0_6 = arith.constant 0 : index
    %c0_7 = arith.constant 0 : index
    %10 = vector.load %arg4[%c0_6, %c0_7] : memref<32x64xbf16, #tpu.memory_space<vmem>>, vector<32x64xbf16>
    %cst_8 = arith.constant dense<0.000000e+00> : vector<256x64xf32>
    %11 = tpu.matmul %9, %10, %cst_8 {dimension_numbers = #tpu.dot_dimension_numbers<[1], [0], [0], [1], [0, 0, 1, 1], [], []>} : vector<256x32xbf16>, vector<32x64xbf16>, vector<256x64xf32> -> vector<256x64xf32>
    %c0_9 = arith.constant 0 : index
    %c0_10 = arith.constant 0 : index
    %12 = vector.load %arg5[%c0_9, %c0_10] : memref<1x64xf32, #tpu.memory_space<vmem>>, vector<1x64xf32>
    %13 = vector.broadcast %12 : vector<1x64xf32> to vector<256x64xf32>
    %14 = arith.addf %11, %13 : vector<256x64xf32>
    %cst_11 = arith.constant 0.000000e+00 : f32
    %15 = vector.broadcast %cst_11 : f32 to vector<256x64xf32>
    %16 = arith.maximumf %14, %15 : vector<256x64xf32>
    %17 = arith.truncf %16 : vector<256x64xf32> to vector<256x64xbf16>
    %c0_12 = arith.constant 0 : index
    %c0_13 = arith.constant 0 : index
    %18 = vector.load %arg6[%c0_12, %c0_13] : memref<64x128xbf16, #tpu.memory_space<vmem>>, vector<64x128xbf16>
    %cst_14 = arith.constant dense<0.000000e+00> : vector<256x128xf32>
    %19 = tpu.matmul %17, %18, %cst_14 {dimension_numbers = #tpu.dot_dimension_numbers<[1], [0], [0], [1], [0, 0, 1, 1], [], []>} : vector<256x64xbf16>, vector<64x128xbf16>, vector<256x128xf32> -> vector<256x128xf32>
    %c0_15 = arith.constant 0 : index
    %c0_16 = arith.constant 0 : index
    %20 = vector.load %arg7[%c0_15, %c0_16] : memref<1x128xf32, #tpu.memory_space<vmem>>, vector<1x128xf32>
    %21 = vector.broadcast %20 : vector<1x128xf32> to vector<256x128xf32>
    %22 = arith.addf %19, %21 : vector<256x128xf32>
    %cst_17 = arith.constant 0.000000e+00 : f32
    %23 = vector.broadcast %cst_17 : f32 to vector<256x128xf32>
    %24 = arith.maximumf %22, %23 : vector<256x128xf32>
    %25 = arith.truncf %24 : vector<256x128xf32> to vector<256x128xbf16>
    %c0_18 = arith.constant 0 : index
    %c0_19 = arith.constant 0 : index
    %26 = vector.load %arg8[%c0_18, %c0_19] : memref<128x256xbf16, #tpu.memory_space<vmem>>, vector<128x256xbf16>
    %cst_20 = arith.constant dense<0.000000e+00> : vector<256x256xf32>
    %27 = tpu.matmul %25, %26, %cst_20 {dimension_numbers = #tpu.dot_dimension_numbers<[1], [0], [0], [1], [0, 0, 1, 1], [], []>} : vector<256x128xbf16>, vector<128x256xbf16>, vector<256x256xf32> -> vector<256x256xf32>
    %c0_21 = arith.constant 0 : index
    %c0_22 = arith.constant 0 : index
    %28 = vector.load %arg9[%c0_21, %c0_22] : memref<1x256xf32, #tpu.memory_space<vmem>>, vector<1x256xf32>
    %29 = vector.broadcast %28 : vector<1x256xf32> to vector<256x256xf32>
    %30 = arith.addf %27, %29 : vector<256x256xf32>
    %cst_23 = arith.constant 0.000000e+00 : f32
    %31 = vector.broadcast %cst_23 : f32 to vector<256x256xf32>
    %32 = arith.maximumf %30, %31 : vector<256x256xf32>
    %33 = arith.truncf %32 : vector<256x256xf32> to vector<256x256xbf16>
    %c0_24 = arith.constant 0 : index
    %c0_25 = arith.constant 0 : index
    %34 = vector.load %arg10[%c0_24, %c0_25] : memref<256x128xbf16, #tpu.memory_space<vmem>>, vector<256x128xbf16>
    %cst_26 = arith.constant dense<0.000000e+00> : vector<256x128xf32>
    %35 = tpu.matmul %33, %34, %cst_26 {dimension_numbers = #tpu.dot_dimension_numbers<[1], [0], [0], [1], [0, 0, 1, 1], [], []>} : vector<256x256xbf16>, vector<256x128xbf16>, vector<256x128xf32> -> vector<256x128xf32>
    %c0_27 = arith.constant 0 : index
    %c0_28 = arith.constant 0 : index
    %36 = vector.load %arg11[%c0_27, %c0_28] : memref<1x128xf32, #tpu.memory_space<vmem>>, vector<1x128xf32>
    %37 = vector.broadcast %36 : vector<1x128xf32> to vector<256x128xf32>
    %38 = arith.addf %35, %37 : vector<256x128xf32>
    %c0_29 = arith.constant 0 : index
    %c0_30 = arith.constant 0 : index
    %39 = vector.load %arg12[%c0_29, %c0_30] : memref<256x128xf32, #tpu.memory_space<vmem>>, vector<256x128xf32>
    tpu.vector_store %arg12[%c0_29, %c0_30], %38 {strides = array<i32>} : memref<256x128xf32, #tpu.memory_space<vmem>>, vector<256x128xf32>,
    return
  }
  func.func @transform_0(%arg0: i32) -> (i32, i32) {
    %c0_i32 = arith.constant 0 : i32
    %c0_i32_0 = arith.constant 0 : i32
    return %arg0, %c0_i32 : i32, i32
  }
  func.func @transform_1(%arg0: i32) -> (i32, i32) {
    %c0_i32 = arith.constant 0 : i32
    %c0_i32_0 = arith.constant 0 : i32
    %c0_i32_1 = arith.constant 0 : i32
    return %c0_i32, %c0_i32_0 : i32, i32
  }
  func.func @transform_2(%arg0: i32) -> (i32, i32) {
    %c0_i32 = arith.constant 0 : i32
    %c0_i32_0 = arith.constant 0 : i32
    %c0_i32_1 = arith.constant 0 : i32
    return %c0_i32, %c0_i32_0 : i32, i32
  }
  func.func @transform_3(%arg0: i32) -> (i32, i32) {
    %c0_i32 = arith.constant 0 : i32
    %c0_i32_0 = arith.constant 0 : i32
    %c0_i32_1 = arith.constant 0 : i32
    return %c0_i32, %c0_i32_0 : i32, i32
  }
  func.func @transform_4(%arg0: i32) -> (i32, i32) {
    %c0_i32 = arith.constant 0 : i32
    %c0_i32_0 = arith.constant 0 : i32
    %c0_i32_1 = arith.constant 0 : i32
    return %c0_i32, %c0_i32_0 : i32, i32
  }
  func.func @transform_5(%arg0: i32) -> (i32, i32) {
    %c0_i32 = arith.constant 0 : i32
    %c0_i32_0 = arith.constant 0 : i32
    %c0_i32_1 = arith.constant 0 : i32
    return %c0_i32, %c0_i32_0 : i32, i32
  }
  func.func @transform_6(%arg0: i32) -> (i32, i32) {
    %c0_i32 = arith.constant 0 : i32
    %c0_i32_0 = arith.constant 0 : i32
    %c0_i32_1 = arith.constant 0 : i32
    return %c0_i32, %c0_i32_0 : i32, i32
  }
  func.func @transform_7(%arg0: i32) -> (i32, i32) {
    %c0_i32 = arith.constant 0 : i32
    %c0_i32_0 = arith.constant 0 : i32
    %c0_i32_1 = arith.constant 0 : i32
    return %c0_i32, %c0_i32_0 : i32, i32
  }
  func.func @transform_8(%arg0: i32) -> (i32, i32) {
    %c0_i32 = arith.constant 0 : i32
    %c0_i32_0 = arith.constant 0 : i32
    %c0_i32_1 = arith.constant 0 : i32
    return %c0_i32, %c0_i32_0 : i32, i32
  }
  func.func @transform_9(%arg0: i32) -> (i32, i32) {
    %c0_i32 = arith.constant 0 : i32
    %c0_i32_0 = arith.constant 0 : i32
    %c0_i32_1 = arith.constant 0 : i32
    return %c0_i32, %c0_i32_0 : i32, i32
  }
  func.func @transform_10(%arg0: i32) -> (i32, i32) {
    %c0_i32 = arith.constant 0 : i32
    %c0_i32_0 = arith.constant 0 : i32
    %c0_i32_1 = arith.constant 0 : i32
    return %c0_i32, %c0_i32_0 : i32, i32
  }
  func.func @transform_11(%arg0: i32) -> (i32, i32) {
    %c0_i32 = arith.constant 0 : i32
    %c0_i32_0 = arith.constant 0 : i32
    return %arg0, %c0_i32 : i32, i32
  }
}

</mosaic_0001>

<bundles_post_ra>
// kernel: tpu_custom_call.1
= control target key start
LH: loop header
LB: loop body
LE: loop exit
PB: predicated region body
PF: predicated region fallthrough
CT: control target
= control target key end

     0   :  { %s3270_s0 = inlined_call_operand.vmem [shape: f32[512,16], index: 0, kind: input, shape index: {}]   ;;  %s3271_s1 = inlined_call_operand.vmem [shape: bf16[16,32], index: 1, kind: input, shape index: {}]   ;;  %s3272_s2 = inlined_call_operand.vmem [shape: f32[1,32], index: 2, kind: input, shape index: {}]   ;;  %s3273_s3 = inlined_call_operand.vmem [shape: bf16[32,64], index: 3, kind: input, shape index: {}]   ;;  %s3274_s4 = inlined_call_operand.vmem [shape: f32[1,64], index: 4, kind: input, shape index: {}]   ;;  %s3275_s5 = inlined_call_operand.vmem [shape: bf16[64,128], index: 5, kind: input, shape index: {}]   ;;  %s3276_s6 = inlined_call_operand.vmem [shape: f32[1,128], index: 6, kind: input, shape index: {}]   ;;  %s3277_s7 = inlined_call_operand.vmem [shape: bf16[128,256], index: 7, kind: input, shape index: {}]   ;;  %s3278_s8 = inlined_call_operand.vmem [shape: f32[1,256], index: 8, kind: input, shape index: {}]   ;;  %s3279_s9 = inlined_call_operand.vmem [shape: bf16[256,128], index: 9, kind: input, shape index: {}]   ;;  %s3280_s10 = inlined_call_operand.vmem [shape: f32[1,128], index: 10, kind: input, shape index: {}]   ;;  %s3281_s11 = inlined_call_operand.hbm [shape: f32[512,128], index: 11, kind: output, shape index: {}]  }
   0x1   :  { %3282 = sst [smem:[#allocation5_spill]] %s3270_s0 }
   0x2   :  { %16 = vsyncpa [#allocation3], 0 }
   0x3   :  { %18 = vsyncpa [#allocation3 + $0x1], 0  ;;  %s2687_s17 = smov 0   ;;  %s2689_s18 = smov 0  }
   0x4   :  { %s2691_s19 = smov 0   ;;  %s2693_s20 = smov 0  }
   0x5 LB: > { %s2708_s21 = sadd.s32 4294967295, %s2621_s20   ;;  %s2089_s22 = sadd.s32 4294967294, %s2621_s20   ;;  %s2621_s20 = sphi %s2693_s20, %s3289_s20   ;;  %s2617_s19 = sphi %s2691_s19, %s3288_s19   ;;  %s2613_s18 = sphi %s2689_s18, %s3287_s18   ;;  %s2609_s17 = sphi %s2687_s17, %s3286_s17  }
   0x6   : > { %s2712_s23 = sadd.s32 1, %s2621_s20   ;;  %s267_s24 = sadd.s32 1, %s2617_s19 }
   0x7   : > { %s264_s25 = ssub.s32 %s2621_s20, %s2712_s23  ;;  %p277_p0 = scmp.ne.s32.totalorder %s2617_s19, %s2613_s18 }
   0x8   : > { %p265_p1 = scmp.eq.s32.totalorder %s264_s25, 0  ;;  %p278_p2 = scmp.eq.s32.totalorder %s2708_s21, 1 }
   0x9   : > { %p283_p3 = scmp.ne.s32.totalorder %s2613_s18, %s2609_s17  ;;  %p284_p4 = scmp.eq.s32.totalorder %s2089_s22, 1 }
   0xa   : > { %s2723_s26 = scalar_select %p265_p1, %s2617_s19, %s267_s24  }
   0xb   : > { %p2725_p5 = por %p278_p2, %p277_p0  ;;  %p2729_p6 = por %p284_p4, %p283_p3 }
   0xc   : > { %p2092_p7 = scmp.ge.s32.totalorder %s2621_s20, 1  ;;  %p341_p8 = scmp.lt.s32.totalorder %s2621_s20, 3 }
   0xe   : > { %p342_p9 = pnand %p2092_p7, %p341_p8 }
   0xf   : > { %s2094_s12 = sshll.u32 (!%p342_p9), %s2708_s21, 5  ;;  %s3285_s0 = sld [smem:[#allocation5_spill]] (!%p342_p9) }
  0x10   : > { %345 = sbr.rel (%p342_p9) target bundleno = 1188 (0x4a4), region = 64  ;;  %p382_p10 = scmp.lt.s32.totalorder (!%p342_p9), %s2094_s12, 63 }
  0x11   : > { %s378_s30 = sand.u32 (!%p342_p9), 1, %s2613_s18   ;;  %s2192_s16 = sshll.u32 (!%p342_p9), %s2708_s21, 12 }
  0x12   : > { %s3222_s29 = scalar_lea.hbm (!%p342_p9), %s3281_s11, %s2192_s16  ;;  %s2624_s13 = smov (!%p342_p9), [#allocation2]  }
  0x13   : > { %s2565_s14 = sshll.u32 (!%p342_p9), %s2624_s13, 4  ;;  %s2566_s14 = int_to_ptr.vmem [resolvable:$false] %s2565_s14 }
  0x14   : > { %s2567_s16 = scalar_lea.vmem (!%p342_p9), %s2566_s14, 8192 }
  0x15   : > { %v2514_v0 = vld [vmem:[%s3271_s1] sm:$0xff]   ;;  %v2515_v1 = vld [vmem:[%s3273_s3 + $0x8] sm:$0xff]   ;;  %s3291_s12 = smov (!%p382_p10, %s2094_s12), 63  ;;  %vm452_vm0 = vcmask 130048   ;;  %v2517_v51 = vld [vmem:[%s3275_s5 + $0x18] sm:$0xff]   ;;  %vm733_vm1 = vcmask 261120  }
  0x16   : > { %2360 = vmatprep.subr.bf16.mxu0 %v2514_v0  ;;  %2470 = vmatprep.subr.bf16.mxu1 %v2514_v0  ;;  %s2095_s15 = sshll.u32 %s3291_s12, 3  ;;  %v2516_v23 = vld [vmem:[%s3273_s3] sm:$0xff]   ;;  %v2518_v52 = vld [vmem:[%s3275_s5 + $0x10] sm:$0xff]   ;;  %v2519_v53 = vld [vmem:[%s3275_s5 + $0x8] sm:$0xff]   ;;  %vm1030_vm2 = vcmask 523264   ;;  %s2093_s12 = sshll.u32 %s378_s30, 8 }
  0x17   : > { %2361 = vmatpush3.bf16.msra.mxu0 %v2514_v0  ;;  %2471 = vmatpush3.bf16.msra.mxu1 %v2514_v0  ;;  %s2745_s24 = scalar_lea.vmem %s3285_s0, %s2095_s15  ;;  %v2810_v56 = vld [vmem:[%s3272_s2] ss:$0 sm:$0xff]  ;;  %s3154_s15 = scalar_lea.vmem [#allocation2], %s2093_s12 }
  0x18   : > { %2394 = vmatprep.subr.bf16.mxu1 %v2515_v1  ;;  %v389_v2 = vld [vmem:[%s2745_s24] sm:$0xff]  ;;  %v390_v3 = vld [vmem:[%s2745_s24 + $0x8] sm:$0xff]  ;;  %v391_v4 = vld [vmem:[%s2745_s24 + $0x10] sm:$0xff]  ;;  %2430 = vmatprep.subr.bf16.mxu0 %v2517_v51  ;;  %s2027_s22 = sshll.u32 %s3154_s15, 4  ;;  %s3230_s12 = scalar_lea.sflag [#allocation3], %s378_s30  ;;  %s3224_s22 = int_to_ptr.vmem [resolvable:$true] %s2027_s22 }
  0x19   : > { %v421_v5 = vpack.c.bf16 %v390_v3, %v389_v2  ;;  %v392_v6 = vld [vmem:[%s2745_s24 + $0x18] sm:$0xff]  ;;  %v393_v7 = vld [vmem:[%s2745_s24 + $0x20] sm:$0xff]  ;;  %v394_v8 = vld [vmem:[%s2745_s24 + $0x28] sm:$0xff]  ;;  %s2561_s21 = scalar_lea.vmem %s3224_s22, 4096  ;;  %p2568_p0 = scmp.lt.s32.totalorder %s3224_s22, %s2566_s14 }
  0x1a   : > { %v422_v9 = vpack.c.bf16 %v392_v6, %v391_v4  ;;  %v423_v10 = vpack.c.bf16 %v394_v8, %v393_v7  ;;  %v395_v11 = vld [vmem:[%s2745_s24 + $0x30] sm:$0xff]  ;;  %v396_v12 = vld [vmem:[%s2745_s24 + $0x38] sm:$0xff]  ;;  %v397_v13 = vld [vmem:[%s2745_s24 + $0x40] sm:$0xff]  ;;  %p2562_p11 = scmp.ne.s32.totalorder %s3224_s22, %s2561_s21  ;;  %p2569_p1 = scmp.lt.s32.totalorder %s2567_s16, %s2561_s21 }
  0x1b   : > { %2362 = vmatprep.mubr.msk.bf16.mxu0 %vm452_vm0, %v421_v5  ;;  %v398_v14 = vld [vmem:[%s2745_s24 + $0x48] sm:$0xff]  ;;  %v405_v15 = vld [vmem:[%s2745_s24 + $0x80] sm:$0xff]  ;;  %v407_v18 = vld [vmem:[%s2745_s24 + $0x90] sm:$0xff]  ;;  %v424_v24 = vpack.c.bf16 %v396_v12, %v395_v11 }
  0x1c   : > { %2363 = vmatmul.mubr.msk.bf16.vlgmr.msra.gmra.mxu0 %vm452_vm0, %v422_v9  ;;  %v406_v16 = vld [vmem:[%s2745_s24 + $0x88] sm:$0xff]  ;;  %v408_v19 = vld [vmem:[%s2745_s24 + $0x98] sm:$0xff]  ;;  %v409_v20 = vld [vmem:[%s2745_s24 + $0xa0] sm:$0xff]  ;;  %v425_v26 = vpack.c.bf16 %v398_v14, %v397_v13  ;;  %p2563_p12 = pnand %p2562_p11, %p2725_p5  ;;  %p2570_p2 = por %p2569_p1, %p2568_p0 }
  0x1d   : > { %2366 = vmatprep.mubr.msk.bf16.mxu0 %vm452_vm0, %v423_v10  ;;  %v429_v17 = vpack.c.bf16 %v406_v16, %v405_v15  ;;  %v430_v21 = vpack.c.bf16 %v408_v19, %v407_v18  ;;  %v410_v22 = vld [vmem:[%s2745_s24 + $0xa8] sm:$0xff]  ;;  %v411_v27 = vld [vmem:[%s2745_s24 + $0xb0] sm:$0xff]  ;;  %v412_v28 = vld [vmem:[%s2745_s24 + $0xb8] sm:$0xff]  ;;  %2431 = vmatpush3.bf16.msra.mxu0 %v2517_v51 }
  0x1e   : > { %v431_v25 = vpack.c.bf16 %v410_v22, %v409_v20  ;;  %v413_v29 = vld [vmem:[%s2745_s24 + $0xc0] sm:$0xff]  ;;  %v414_v30 = vld [vmem:[%s2745_s24 + $0xc8] sm:$0xff]  ;;  %v399_v31 = vld [vmem:[%s2745_s24 + $0x50] sm:$0xff]  ;;  %v432_v35 = vpack.c.bf16 %v412_v28, %v411_v27  ;;  %2432 = vmatprep.subr.bf16.mxu0 %v2518_v52  ;;  %p2564_p13 = pneg %p2563_p12 }
  0x1f   : > { %2378 = vmatprep.mubr.msk.bf16.mxu1 %vm452_vm0, %v429_v17  ;;  %v400_v32 = vld [vmem:[%s2745_s24 + $0x58] sm:$0xff]  ;;  %v401_v33 = vld [vmem:[%s2745_s24 + $0x60] sm:$0xff]  ;;  %v402_v34 = vld [vmem:[%s2745_s24 + $0x68] sm:$0xff]  ;;  %v433_v36 = vpack.c.bf16 %v414_v30, %v413_v29 }
  0x20   : > { %2379 = vmatmul.mubr.msk.bf16.vlgmr.msra.gmra.mxu1 %vm452_vm0, %v430_v21  ;;  %v426_v37 = vpack.c.bf16 %v400_v32, %v399_v31  ;;  %v415_v38 = vld [vmem:[%s2745_s24 + $0xd0] sm:$0xff]  ;;  %v416_v39 = vld [vmem:[%s2745_s24 + $0xd8] sm:$0xff]  ;;  %v427_v40 = vpack.c.bf16 %v402_v34, %v401_v33  ;;  %v417_v41 = vld [vmem:[%s2745_s24 + $0xe0] sm:$0xff]  ;;  %p2571_p3 = pnand %p2570_p2, %p2564_p13 }
  0x21   : > { %2382 = vmatprep.mubr.msk.bf16.mxu1 %vm452_vm0, %v431_v25  ;;  %2395 = vmatpush3.bf16.msra.mxu1 %v2515_v1  ;;  %v418_v42 = vld [vmem:[%s2745_s24 + $0xe8] sm:$0xff]  ;;  %v403_v43 = vld [vmem:[%s2745_s24 + $0x70] sm:$0xff]  ;;  %v404_v44 = vld [vmem:[%s2745_s24 + $0x78] sm:$0xff]  ;;  %v434_v45 = vpack.c.bf16 %v416_v39, %v415_v38 }
  0x22   : > { %2396 = vmatprep.subr.bf16.mxu1 %v2516_v23  ;;  %v435_v46 = vpack.c.bf16 %v418_v42, %v417_v41  ;;  %v428_v47 = vpack.c.bf16 %v404_v44, %v403_v43  ;;  %v419_v48 = vld [vmem:[%s2745_s24 + $0xf0] sm:$0xff]  ;;  %v420_v49 = vld [vmem:[%s2745_s24 + $0xf8] sm:$0xff]  ;;  %2433 = vmatpush3.bf16.msra.mxu0 %v2518_v52 }
  0x23   : > { %v436_v50 = vpack.c.bf16 %v420_v49, %v419_v48  ;;  %2434 = vmatprep.subr.bf16.mxu0 %v2519_v53 }
  0x24   : > { %2367 = vmatmul.mubr.msk.bf16.gmra.mxu0 %vm452_vm0, %v424_v24 }
  0x25   : > { %2370 = vmatprep.mubr.msk.bf16.mxu0 %vm452_vm0, %v425_v26  ;;  %2397 = vmatpush3.bf16.msra.mxu1 %v2516_v23 }
  0x26   : > { %2435 = vmatpush3.bf16.msra.mxu0 %v2519_v53 }
  0x28   : > { %2383 = vmatmul.mubr.msk.bf16.gmra.mxu1 %vm452_vm0, %v432_v35 }
  0x29   : > { %2386 = vmatprep.mubr.msk.bf16.mxu1 %vm452_vm0, %v433_v36 }
  0x2c   : > { %2371 = vmatmul.mubr.msk.bf16.gmra.mxu0 %vm452_vm0, %v426_v37 }
  0x2d   : > { %2374 = vmatprep.mubr.msk.bf16.mxu0 %vm452_vm0, %v427_v40 }
  0x30   : > { %2387 = vmatmul.mubr.msk.bf16.gmra.mxu1 %vm452_vm0, %v434_v45 }
  0x31   : > { %2390 = vmatprep.mubr.msk.bf16.mxu1 %vm452_vm0, %v435_v46 }
  0x34   : > { %2375 = vmatmul.mubr.msk.bf16.gmra.mxu0 %vm452_vm0, %v428_v47 }
  0x38   : > { %2391 = vmatmul.mubr.msk.bf16.gmra.mxu1 %vm452_vm0, %v436_v50 }
  0xdc   : > { %v2364_v54 = vpop.f32.mrf.mxu0 }
  0xdd   : > { %v544_v61 = vadd.f32 %v2364_v54, %v2810_v56 }
  0xde   : > { %v535_v55 = vpop.f32.mrf.mxu0 }
  0xdf   : > { %v536_v58 = vadd.f32 %v2810_v56, %v535_v55  ;;  %v664_v6 = vmax.f32 %v544_v61, 0.0 }
  0xe0   : > { %v2365_v57 = vpop.f32.mrf.mxu0  ;;  %v2814_v60 = vpop.f32.mrf.mxu1 }
  0xe1   : > { %v547_v59 = vadd.f32 %v2365_v57, %v2810_v56  ;;  %v662_v3 = vmax.f32 %v536_v58, 0.0 }
  0xe2   : > { %v538_v62 = vpop.f32.mrf.mxu0  ;;  %v599_v0 = vpop.f32.mrf.mxu1 }
  0xe3   : > { %v539_v63 = vadd.f32 %v2810_v56, %v538_v62  ;;  %v665_v1 = vmax.f32 %v547_v59, 0.0  ;;  %v600_v44 = vadd.f32 %v2810_v56, %v599_v0 }
  0xe4   : > { %v2368_v2 = vpop.f32.mrf.mxu0  ;;  %v2818_v5 = vpop.f32.mrf.mxu1 }
  0xe5   : > { %v663_v4 = vmax.f32 %v539_v63, 0.0  ;;  %v560_v7 = vadd.f32 %v2368_v2, %v2810_v56  ;;  %v695_v12 = vpack.c.bf16 %v665_v1, %v664_v6  ;;  %v678_v53 = vmax.f32 %v600_v44, 0.0  ;;  %v2529_v44 = vld [vmem:[%s3277_s7 + $0x54] ss:$8 sps:$4 sm:$0xff]  }
  0xe6   : > { %v551_v8 = vpop.f32.mrf.mxu0  ;;  %v602_v11 = vpop.f32.mrf.mxu1  ;;  %v608_v63 = vadd.f32 %v2814_v60, %v2810_v56  ;;  %v611_v0 = vadd.f32 %v2818_v5, %v2810_v56 }
  0xe7   : > { %v694_v9 = vpack.c.bf16 %v663_v4, %v662_v3  ;;  %v552_v10 = vadd.f32 %v2810_v56, %v551_v8  ;;  %v668_v16 = vmax.f32 %v560_v7, 0.0  ;;  %v603_v48 = vadd.f32 %v2810_v56, %v602_v11 }
  0xe8   : > { %v2369_v13 = vpop.f32.mrf.mxu0  ;;  %v2824_v15 = vpop.f32.mrf.mxu1  ;;  %v680_v8 = vmax.f32 %v608_v63, 0.0 }
  0xe9   : > { %v563_v14 = vadd.f32 %v2369_v13, %v2810_v56  ;;  %2398 = vmatprep.mubr.msk.bf16.mxu1 %vm733_vm1, %v694_v9  ;;  %v666_v18 = vmax.f32 %v552_v10, 0.0  ;;  %v679_v59 = vmax.f32 %v603_v48, 0.0  ;;  %v681_v9 = vmax.f32 %v611_v0, 0.0  ;;  %v2535_v48 = vld [vmem:[%s3277_s7 + $0x34] ss:$8 sps:$4 sm:$0xff]  }
  0xea   : > { %v554_v17 = vpop.f32.mrf.mxu0  ;;  %2399 = vmatmul.mubr.msk.bf16.vlgmr.msra.gmra.mxu1 %vm733_vm1, %v695_v12  ;;  %v615_v21 = vpop.f32.mrf.mxu1  ;;  %v624_v12 = vadd.f32 %v2824_v15, %v2810_v56 }
  0xeb   : > { %v669_v19 = vmax.f32 %v563_v14, 0.0  ;;  %v555_v20 = vadd.f32 %v2810_v56, %v554_v17  ;;  %v702_v3 = vpack.c.bf16 %v679_v59, %v678_v53  ;;  %v616_v4 = vadd.f32 %v2810_v56, %v615_v21  ;;  %v2539_v53 = vld [vmem:[%s3277_s7 + $0x10] ss:$8 sps:$4 sm:$0xff]  }
  0xec   : > { %v2372_v22 = vpop.f32.mrf.mxu0  ;;  %v2385_v24 = vpop.f32.mrf.mxu1  ;;  %v703_v5 = vpack.c.bf16 %v681_v9, %v680_v8 }
  0xed   : > { %v667_v23 = vmax.f32 %v555_v20, 0.0  ;;  %v697_v25 = vpack.c.bf16 %v669_v19, %v668_v16  ;;  %v576_v26 = vadd.f32 %v2372_v22, %v2810_v56  ;;  %v682_v60 = vmax.f32 %v616_v4, 0.0 }
  0xee   : > { %v567_v27 = vpop.f32.mrf.mxu0  ;;  %v618_v31 = vpop.f32.mrf.mxu1  ;;  %v627_v13 = vadd.f32 %v2385_v24, %v2810_v56  ;;  %v684_v19 = vmax.f32 %v624_v12, 0.0 }
  0xef   : > { %v696_v28 = vpack.c.bf16 %v667_v23, %v666_v18  ;;  %v568_v29 = vadd.f32 %v2810_v56, %v567_v27  ;;  %v672_v33 = vmax.f32 %v576_v26, 0.0  ;;  %v619_v6 = vadd.f32 %v2810_v56, %v618_v31 }
  0xf0   : > { %v2373_v30 = vpop.f32.mrf.mxu0  ;;  %v2388_v35 = vpop.f32.mrf.mxu1  ;;  %v685_v20 = vmax.f32 %v627_v13, 0.0 }
  0xf1   : > { %v579_v32 = vadd.f32 %v2373_v30, %v2810_v56  ;;  %2402 = vmatprep.mubr.msk.bf16.mxu1 %vm733_vm1, %v696_v28  ;;  %v670_v36 = vmax.f32 %v568_v29, 0.0  ;;  %v683_v10 = vmax.f32 %v619_v6, 0.0  ;;  %v640_v15 = vadd.f32 %v2388_v35, %v2810_v56 }
  0xf2   : > { %v570_v34 = vpop.f32.mrf.mxu0  ;;  %2403 = vmatmul.mubr.msk.bf16.gmra.mxu1 %vm733_vm1, %v697_v25  ;;  %v631_v45 = vpop.f32.mrf.mxu1  ;;  %v705_v25 = vpack.c.bf16 %v685_v20, %v684_v19 }
  0xf3   : > { %v673_v37 = vmax.f32 %v579_v32, 0.0  ;;  %v571_v38 = vadd.f32 %v2810_v56, %v570_v34  ;;  %v704_v14 = vpack.c.bf16 %v683_v10, %v682_v60  ;;  %v632_v16 = vadd.f32 %v2810_v56, %v631_v45  ;;  %v2527_v45 = vld [vmem:[%s3277_s7 + $0x50] ss:$8 sps:$4 sm:$0xff]  }
  0xf4   : > { %v2376_v39 = vpop.f32.mrf.mxu0  ;;  %v2389_v54 = vpop.f32.mrf.mxu1  ;;  %v688_v29 = vmax.f32 %v640_v15, 0.0 }
  0xf5   : > { %v671_v40 = vmax.f32 %v571_v38, 0.0  ;;  %v699_v41 = vpack.c.bf16 %v673_v37, %v672_v33  ;;  %v592_v42 = vadd.f32 %v2376_v39, %v2810_v56  ;;  %v686_v21 = vmax.f32 %v632_v16, 0.0 }
  0xf6   : > { %v583_v43 = vpop.f32.mrf.mxu0  ;;  %v634_v1 = vpop.f32.mrf.mxu1  ;;  %v643_v24 = vadd.f32 %v2389_v54, %v2810_v56 }
  0xf7   : > { %v698_v46 = vpack.c.bf16 %v671_v40, %v670_v36  ;;  %v584_v47 = vadd.f32 %v2810_v56, %v583_v43  ;;  %v676_v51 = vmax.f32 %v592_v42, 0.0  ;;  %v635_v17 = vadd.f32 %v2810_v56, %v634_v1  ;;  %v2520_v40 = vld [vmem:[%s3275_s5] sm:$0xff]  }
  0xf8   : > { %v2377_v49 = vpop.f32.mrf.mxu0  ;;  %v2392_v7 = vpop.f32.mrf.mxu1  ;;  %v689_v30 = vmax.f32 %v643_v24, 0.0  ;;  %2436 = vmatprep.subr.bf16.mxu0 %v2520_v40  ;;  %v2526_v42 = vld [vmem:[%s3277_s7 + $0x64] ss:$8 sps:$4 sm:$0xff]   ;;  %v2524_v43 = vld [vmem:[%s3277_s7 + $0x60] ss:$8 sps:$4 sm:$0xff]  }
  0xf9   : > { %2406 = vmatprep.mubr.msk.bf16.mxu1 %vm733_vm1, %v698_v46  ;;  %v595_v50 = vadd.f32 %v2377_v49, %v2810_v56  ;;  %v674_v55 = vmax.f32 %v584_v47, 0.0  ;;  %v687_v22 = vmax.f32 %v635_v17, 0.0  ;;  %v656_v34 = vadd.f32 %v2392_v7, %v2810_v56  ;;  %2437 = vmatpush3.bf16.msra.mxu0 %v2520_v40  ;;  %v2532_v46 = vld [vmem:[%s3277_s7 + $0x44] ss:$8 sps:$4 sm:$0xff]   ;;  %v2530_v47 = vld [vmem:[%s3277_s7 + $0x40] ss:$8 sps:$4 sm:$0xff]  }
  0xfa   : > { %2407 = vmatmul.mubr.msk.bf16.gmra.mxu1 %vm733_vm1, %v699_v41  ;;  %v586_v52 = vpop.f32.mrf.mxu0  ;;  %v647_v11 = vpop.f32.mrf.mxu1  ;;  %v707_v33 = vpack.c.bf16 %v689_v30, %v688_v29  ;;  %v2523_v41 = vld [vmem:[%s3277_s7 + $0x74] ss:$8 sps:$4 sm:$0xff]   ;;  %v2533_v49 = vld [vmem:[%s3277_s7 + $0x30] ss:$8 sps:$4 sm:$0xff]  }
  0xfb   : > { %v677_v57 = vmax.f32 %v595_v50, 0.0  ;;  %v587_v58 = vadd.f32 %v2810_v56, %v586_v52  ;;  %v706_v26 = vpack.c.bf16 %v687_v22, %v686_v21  ;;  %v648_v27 = vadd.f32 %v2810_v56, %v647_v11  ;;  %1396 = vmatprep.subr.bf16.mxu1 %v2523_v41  ;;  %v2538_v50 = vld [vmem:[%s3277_s7 + $0x24] ss:$8 sps:$4 sm:$0xff]   ;;  %v2541_v52 = vld [vmem:[%s3277_s7 + $0x14] ss:$8 sps:$4 sm:$0xff]  }
  0xfc   : > { %v2393_v18 = vpop.f32.mrf.mxu1  ;;  %v692_v37 = vmax.f32 %v656_v34, 0.0 }
  0xfd   : > { %v675_v61 = vmax.f32 %v587_v58, 0.0  ;;  %v701_v62 = vpack.c.bf16 %v677_v57, %v676_v51  ;;  %v690_v31 = vmax.f32 %v648_v27, 0.0  ;;  %v659_v35 = vadd.f32 %v2393_v18, %v2810_v56  ;;  %v2536_v51 = vld [vmem:[%s3277_s7 + $0x20] ss:$8 sps:$4 sm:$0xff]  }
  0xfe   : > { %v650_v23 = vpop.f32.mrf.mxu1  ;;  %v2917_v57 = vld [vmem:[%s3274_s4] ss:$0 sm:$0xff] }
  0xff   : > { %v700_v2 = vpack.c.bf16 %v675_v61, %v674_v55  ;;  %v651_v28 = vadd.f32 %v2810_v56, %v650_v23  ;;  %v693_v38 = vmax.f32 %v659_v35, 0.0  ;;  %v2521_v56 = vld [vmem:[%s3277_s7 + $0x70] ss:$8 sps:$4 sm:$0xff]  }
 0x100   : > { %1397 = vmatpush1.bf16.msra.mxu1 %v2521_v56 }
 0x101   : > { %2410 = vmatprep.mubr.msk.bf16.mxu1 %vm733_vm1, %v700_v2  ;;  %v691_v32 = vmax.f32 %v651_v28, 0.0  ;;  %v709_v39 = vpack.c.bf16 %v693_v38, %v692_v37  ;;  %1398 = vmatprep.subr.bf16.mxu1 %v2526_v42 }
 0x102   : > { %2411 = vmatmul.mubr.msk.bf16.gmra.mxu1 %vm733_vm1, %v701_v62 }
 0x103   : > { %2414 = vmatprep.mubr.msk.bf16.mxu1 %vm733_vm1, %v702_v3  ;;  %v708_v36 = vpack.c.bf16 %v691_v32, %v690_v31 }
 0x104   : > { %1399 = vmatpush1.bf16.msra.mxu1 %v2524_v43 }
 0x105   : > { %1400 = vmatprep.subr.bf16.mxu1 %v2529_v44 }
 0x108   : > { %1401 = vmatpush1.bf16.msra.mxu1 %v2527_v45 }
 0x109   : > { %1402 = vmatprep.subr.bf16.mxu1 %v2532_v46 }
 0x10a   : > { %2415 = vmatmul.mubr.msk.bf16.gmra.mxu1 %vm733_vm1, %v703_v5 }
 0x10b   : > { %2418 = vmatprep.mubr.msk.bf16.mxu1 %vm733_vm1, %v704_v14 }
 0x10c   : > { %1403 = vmatpush1.bf16.msra.mxu1 %v2530_v47 }
 0x10d   : > { %1404 = vmatprep.subr.bf16.mxu1 %v2535_v48 }
 0x110   : > { %1405 = vmatpush1.bf16.msra.mxu1 %v2533_v49 }
 0x111   : > { %1406 = vmatprep.subr.bf16.mxu1 %v2538_v50 }
 0x112   : > { %2419 = vmatmul.mubr.msk.bf16.gmra.mxu1 %vm733_vm1, %v705_v25 }
 0x113   : > { %2422 = vmatprep.mubr.msk.bf16.mxu1 %vm733_vm1, %v706_v26 }
 0x114   : > { %1407 = vmatpush1.bf16.msra.mxu1 %v2536_v51 }
 0x115   : > { %1408 = vmatprep.subr.bf16.mxu1 %v2541_v52 }
 0x118   : > { %1409 = vmatpush1.bf16.msra.mxu1 %v2539_v53 }
 0x11a   : > { %2423 = vmatmul.mubr.msk.bf16.gmra.mxu1 %vm733_vm1, %v707_v33 }
 0x11b   : > { %2426 = vmatprep.mubr.msk.bf16.mxu1 %vm733_vm1, %v708_v36 }
 0x122   : > { %2427 = vmatmul.mubr.msk.bf16.gmra.mxu1 %vm733_vm1, %v709_v39 }
 0x1aa   : > { %v2400_v54 = vpop.f32.mrf.mxu1 }
 0x1ab   : > { %v825_v62 = vadd.f32 %v2400_v54, %v2917_v57 }
 0x1ac   : > { %v816_v55 = vpop.f32.mrf.mxu1 }
 0x1ad   : > { %v817_v59 = vadd.f32 %v2917_v57, %v816_v55  ;;  %v945_v6 = vmax.f32 %v825_v62, 0.0 }
 0x1ae   : > { %v2401_v58 = vpop.f32.mrf.mxu1 }
 0x1af   : > { %v828_v61 = vadd.f32 %v2401_v58, %v2917_v57  ;;  %v943_v3 = vmax.f32 %v817_v59, 0.0 }
 0x1b0   : > { %v819_v63 = vpop.f32.mrf.mxu1 }
 0x1b1   : > { %v820_v0 = vadd.f32 %v2917_v57, %v819_v63  ;;  %v946_v1 = vmax.f32 %v828_v61, 0.0 }
 0x1b2   : > { %v2404_v2 = vpop.f32.mrf.mxu1 }
 0x1b3   : > { %v944_v4 = vmax.f32 %v820_v0, 0.0  ;;  %v976_v9 = vpack.c.bf16 %v946_v1, %v945_v6  ;;  %v841_v5 = vadd.f32 %v2404_v2, %v2917_v57 }
 0x1b4   : > { %v832_v7 = vpop.f32.mrf.mxu1 }
 0x1b5   : > { %v975_v8 = vpack.c.bf16 %v944_v4, %v943_v3  ;;  %v833_v10 = vadd.f32 %v2917_v57, %v832_v7  ;;  %v949_v19 = vmax.f32 %v841_v5, 0.0 }
 0x1b6   : > { %v2405_v60 = vpop.f32.mrf.mxu1 }
 0x1b7   : > { %v844_v11 = vadd.f32 %v2405_v60, %v2917_v57  ;;  %2438 = vmatprep.mubr.msk.bf16.mxu0 %vm1030_vm2, %v975_v8  ;;  %v947_v17 = vmax.f32 %v833_v10, 0.0 }
 0x1b8   : > { %v835_v12 = vpop.f32.mrf.mxu1  ;;  %2439 = vmatmul.mubr.msk.bf16.vlgmr.msra.gmra.mxu0 %vm1030_vm2, %v976_v9 }
 0x1b9   : > { %v836_v13 = vadd.f32 %v2917_v57, %v835_v12  ;;  %v950_v14 = vmax.f32 %v844_v11, 0.0 }
 0x1ba   : > { %v2408_v16 = vpop.f32.mrf.mxu1 }
 0x1bb   : > { %v948_v18 = vmax.f32 %v836_v13, 0.0  ;;  %v857_v20 = vadd.f32 %v2408_v16, %v2917_v57  ;;  %v978_v25 = vpack.c.bf16 %v950_v14, %v949_v19 }
 0x1bc   : > { %v848_v21 = vpop.f32.mrf.mxu1 }
 0x1bd   : > { %v977_v22 = vpack.c.bf16 %v948_v18, %v947_v17  ;;  %v849_v23 = vadd.f32 %v2917_v57, %v848_v21  ;;  %v953_v26 = vmax.f32 %v857_v20, 0.0 }
 0x1be   : > { %v2409_v15 = vpop.f32.mrf.mxu1 }
 0x1bf   : > { %v860_v24 = vadd.f32 %v2409_v15, %v2917_v57  ;;  %2442 = vmatprep.mubr.msk.bf16.mxu0 %vm1030_vm2, %v977_v22  ;;  %v951_v28 = vmax.f32 %v849_v23, 0.0 }
 0x1c0   : > { %v851_v27 = vpop.f32.mrf.mxu1  ;;  %2443 = vmatmul.mubr.msk.bf16.gmra.mxu0 %vm1030_vm2, %v978_v25 }
 0x1c1   : > { %v954_v29 = vmax.f32 %v860_v24, 0.0  ;;  %v852_v30 = vadd.f32 %v2917_v57, %v851_v27 }
 0x1c2   : > { %v2412_v31 = vpop.f32.mrf.mxu1 }
 0x1c3   : > { %v952_v32 = vmax.f32 %v852_v30, 0.0  ;;  %v980_v33 = vpack.c.bf16 %v954_v29, %v953_v26  ;;  %v873_v34 = vadd.f32 %v2412_v31, %v2917_v57 }
 0x1c4   : > { %v864_v35 = vpop.f32.mrf.mxu1 }
 0x1c5   : > { %v979_v36 = vpack.c.bf16 %v952_v32, %v951_v28  ;;  %v865_v37 = vadd.f32 %v2917_v57, %v864_v35  ;;  %v957_v40 = vmax.f32 %v873_v34, 0.0 }
 0x1c6   : > { %v2413_v38 = vpop.f32.mrf.mxu1 }
 0x1c7   : > { %2446 = vmatprep.mubr.msk.bf16.mxu0 %vm1030_vm2, %v979_v36  ;;  %v876_v39 = vadd.f32 %v2413_v38, %v2917_v57  ;;  %v955_v41 = vmax.f32 %v865_v37, 0.0 }
 0x1c8   : > { %2447 = vmatmul.mubr.msk.bf16.gmra.mxu0 %vm1030_vm2, %v980_v33  ;;  %v867_v56 = vpop.f32.mrf.mxu1 }
 0x1c9   : > { %v958_v42 = vmax.f32 %v876_v39, 0.0  ;;  %v868_v43 = vadd.f32 %v2917_v57, %v867_v56  ;;  %v2544_v56 = vld [vmem:[%s3277_s7 + $0x4] ss:$8 sps:$4 sm:$0xff]  }
 0x1ca   : > { %v2416_v44 = vpop.f32.mrf.mxu1  ;;  %1410 = vmatprep.subr.bf16.mxu1 %v2544_v56 }
 0x1cb   : > { %v956_v45 = vmax.f32 %v868_v43, 0.0  ;;  %v982_v46 = vpack.c.bf16 %v958_v42, %v957_v40  ;;  %v889_v47 = vadd.f32 %v2416_v44, %v2917_v57  ;;  %v2623_v42 = vmov 0   ;;  %v2977_v44 = vld [vmem:[%s3276_s6] ss:$0 sm:$0xff] }
 0x1cc   : > { %v880_v48 = vpop.f32.mrf.mxu1  ;;  %1428 = vmatprep.mubr.bf16.mxu1 %v2623_v42 }
 0x1cd   : > { %v981_v49 = vpack.c.bf16 %v956_v45, %v955_v41  ;;  %v881_v50 = vadd.f32 %v2917_v57, %v880_v48  ;;  %v961_v53 = vmax.f32 %v889_v47, 0.0  ;;  %v2542_v41 = vld [vmem:[%s3277_s7] ss:$8 sps:$4 sm:$0xff]   ;;  %v2545_v47 = vld [vmem:[%s3279_s9 + $0x78] sm:$0xff]  }
 0x1ce   : > { %v2417_v51 = vpop.f32.mrf.mxu1  ;;  %1411 = vmatpush1.bf16.msra.mxu1 %v2542_v41  ;;  %v2546_v48 = vld [vmem:[%s3279_s9 + $0x38] sm:$0xff]   ;;  %2248 = vmatprep.subr.bf16.mxu0 %v2545_v47 }
 0x1cf   : > { %2450 = vmatprep.mubr.msk.bf16.mxu0 %vm1030_vm2, %v981_v49  ;;  %v892_v52 = vadd.f32 %v2417_v51, %v2917_v57  ;;  %v959_v55 = vmax.f32 %v881_v50, 0.0  ;;  %v2547_v49 = vld [vmem:[%s3279_s9 + $0x70] sm:$0xff]   ;;  %2249 = vmatpush3.bf16.msra.mxu0 %v2546_v48 }
 0x1d0   : > { %2451 = vmatmul.mubr.msk.bf16.gmra.mxu0 %vm1030_vm2, %v982_v46  ;;  %v883_v54 = vpop.f32.mrf.mxu1  ;;  %2250 = vmatprep.subr.bf16.mxu0 %v2547_v49 }
 0x1d1   : > { %v962_v58 = vmax.f32 %v892_v52, 0.0  ;;  %v884_v59 = vadd.f32 %v2917_v57, %v883_v54 }
 0x1d2   : > { %v2420_v61 = vpop.f32.mrf.mxu1 }
 0x1d3   : > { %v960_v62 = vmax.f32 %v884_v59, 0.0  ;;  %v984_v63 = vpack.c.bf16 %v962_v58, %v961_v53  ;;  %v905_v0 = vadd.f32 %v2420_v61, %v2917_v57  ;;  %v2548_v53 = vld [vmem:[%s3279_s9 + $0x30] sm:$0xff]   ;;  %v2549_v58 = vld [vmem:[%s3279_s9 + $0x68] sm:$0xff]  }
 0x1d4   : > { %v896_v1 = vpop.f32.mrf.mxu1  ;;  %2251 = vmatpush3.bf16.msra.mxu0 %v2548_v53 }
 0x1d5   : > { %v983_v2 = vpack.c.bf16 %v960_v62, %v959_v55  ;;  %v897_v3 = vadd.f32 %v2917_v57, %v896_v1  ;;  %v965_v7 = vmax.f32 %v905_v0, 0.0  ;;  %v2550_v0 = vld [vmem:[%s3279_s9 + $0x28] sm:$0xff]   ;;  %2252 = vmatprep.subr.bf16.mxu0 %v2549_v58 }
 0x1d6   : > { %v2421_v4 = vpop.f32.mrf.mxu1 }
 0x1d7   : > { %2454 = vmatprep.mubr.msk.bf16.mxu0 %vm1030_vm2, %v983_v2  ;;  %v908_v6 = vadd.f32 %v2421_v4, %v2917_v57  ;;  %v963_v9 = vmax.f32 %v897_v3, 0.0  ;;  %v2551_v2 = vld [vmem:[%s3279_s9 + $0x60] sm:$0xff]  }
 0x1d8   : > { %2455 = vmatmul.mubr.msk.bf16.gmra.mxu0 %vm1030_vm2, %v984_v63  ;;  %v899_v8 = vpop.f32.mrf.mxu1 }
 0x1d9   : > { %v966_v60 = vmax.f32 %v908_v6, 0.0  ;;  %v900_v10 = vadd.f32 %v2917_v57, %v899_v8  ;;  %2253 = vmatpush3.bf16.msra.mxu0 %v2550_v0  ;;  %v2552_v6 = vld [vmem:[%s3279_s9 + $0x20] sm:$0xff]   ;;  %v2553_v8 = vld [vmem:[%s3279_s9 + $0x58] sm:$0xff]  }
 0x1da   : > { %v2424_v11 = vpop.f32.mrf.mxu1  ;;  %2254 = vmatprep.subr.bf16.mxu0 %v2551_v2 }
 0x1db   : > { %v964_v5 = vmax.f32 %v900_v10, 0.0  ;;  %v986_v12 = vpack.c.bf16 %v966_v60, %v965_v7  ;;  %v921_v13 = vadd.f32 %v2424_v11, %v2917_v57  ;;  %v2554_v11 = vld [vmem:[%s3279_s9 + $0x18] sm:$0xff]  }
 0x1dc   : > { %v912_v14 = vpop.f32.mrf.mxu1 }
 0x1dd   : > { %v985_v16 = vpack.c.bf16 %v964_v5, %v963_v9  ;;  %v913_v17 = vadd.f32 %v2917_v57, %v912_v14  ;;  %v969_v20 = vmax.f32 %v921_v13, 0.0  ;;  %2255 = vmatpush3.bf16.msra.mxu0 %v2552_v6 }
 0x1de   : > { %v2425_v18 = vpop.f32.mrf.mxu1  ;;  %2256 = vmatprep.subr.bf16.mxu0 %v2553_v8 }
 0x1df   : > { %2458 = vmatprep.mubr.msk.bf16.mxu0 %vm1030_vm2, %v985_v16  ;;  %v924_v19 = vadd.f32 %v2425_v18, %v2917_v57  ;;  %v967_v22 = vmax.f32 %v913_v17, 0.0  ;;  %v2556_v16 = vld [vmem:[%s3279_s9 + $0x10] sm:$0xff]   ;;  %v2557_v18 = vld [vmem:[%s3279_s9 + $0x48] sm:$0xff]  }
 0x1e0   : > { %2459 = vmatmul.mubr.msk.bf16.gmra.mxu0 %vm1030_vm2, %v986_v12  ;;  %v915_v21 = vpop.f32.mrf.mxu1  ;;  %v2555_v12 = vld [vmem:[%s3279_s9 + $0x50] sm:$0xff]  }
 0x1e1   : > { %v970_v23 = vmax.f32 %v924_v19, 0.0  ;;  %v916_v25 = vadd.f32 %v2917_v57, %v915_v21  ;;  %2257 = vmatpush3.bf16.msra.mxu0 %v2554_v11  ;;  %v2559_v11 = vld [vmem:[%s3279_s9 + $0x40] sm:$0xff]  }
 0x1e2   : > { %v2428_v15 = vpop.f32.mrf.mxu1  ;;  %2258 = vmatprep.subr.bf16.mxu0 %v2555_v12 }
 0x1e3   : > { %v968_v24 = vmax.f32 %v916_v25, 0.0  ;;  %v988_v26 = vpack.c.bf16 %v970_v23, %v969_v20  ;;  %v937_v27 = vadd.f32 %v2428_v15, %v2917_v57 }
 0x1e4   : > { %v928_v28 = vpop.f32.mrf.mxu1 }
 0x1e5   : > { %v987_v29 = vpack.c.bf16 %v968_v24, %v967_v22  ;;  %v929_v30 = vadd.f32 %v2917_v57, %v928_v28  ;;  %v973_v33 = vmax.f32 %v937_v27, 0.0  ;;  %2259 = vmatpush3.bf16.msra.mxu0 %v2556_v16  ;;  %v2558_v22 = vld [vmem:[%s3279_s9 + $0x8] sm:$0xff]  }
 0x1e6   : > { %v2429_v31 = vpop.f32.mrf.mxu1  ;;  %2260 = vmatprep.subr.bf16.mxu0 %v2557_v18 }
 0x1e7   : > { %2462 = vmatprep.mubr.msk.bf16.mxu0 %vm1030_vm2, %v987_v29  ;;  %v940_v32 = vadd.f32 %v2429_v31, %v2917_v57  ;;  %v971_v35 = vmax.f32 %v929_v30, 0.0 }
 0x1e8   : > { %2463 = vmatmul.mubr.msk.bf16.gmra.mxu0 %vm1030_vm2, %v988_v26  ;;  %v931_v34 = vpop.f32.mrf.mxu1 }
 0x1e9   : > { %v974_v36 = vmax.f32 %v940_v32, 0.0  ;;  %v932_v37 = vadd.f32 %v2917_v57, %v931_v34  ;;  %2261 = vmatpush3.bf16.msra.mxu0 %v2558_v22 }
 0x1ea   : > { %2262 = vmatprep.subr.bf16.mxu0 %v2559_v11 }
 0x1eb   : > { %v972_v38 = vmax.f32 %v932_v37, 0.0  ;;  %v990_v39 = vpack.c.bf16 %v974_v36, %v973_v33 }
 0x1ed   : > { %v989_v40 = vpack.c.bf16 %v972_v38, %v971_v35 }
 0x1ef   : > { %2466 = vmatprep.mubr.msk.bf16.mxu0 %vm1030_vm2, %v989_v40 }
 0x1f0   : > { %2467 = vmatmul.mubr.msk.bf16.gmra.mxu0 %vm1030_vm2, %v990_v39 }
 0x278   : > { %v2440_v57 = vpop.f32.mrf.mxu0 }
 0x279   : > { %v1122_v1 = vadd.f32 %v2440_v57, %v2977_v44 }
 0x27a   : > { %v1113_v43 = vpop.f32.mrf.mxu0 }
 0x27b   : > { %v1114_v46 = vadd.f32 %v2977_v44, %v1113_v43  ;;  %v1242_v7 = vmax.f32 %v1122_v1, 0.0 }
 0x27c   : > { %v2441_v45 = vpop.f32.mrf.mxu0 }
 0x27d   : > { %v1240_v54 = vmax.f32 %v1114_v46, 0.0  ;;  %v1125_v61 = vadd.f32 %v2441_v45, %v2977_v44 }
 0x27e   : > { %v1116_v50 = vpop.f32.mrf.mxu0 }
 0x27f   : > { %v1117_v51 = vadd.f32 %v2977_v44, %v1116_v50  ;;  %v1243_v3 = vmax.f32 %v1125_v61, 0.0 }
 0x280   : > { %v2444_v52 = vpop.f32.mrf.mxu0 }
 0x281   : > { %v1241_v55 = vmax.f32 %v1117_v51, 0.0  ;;  %v1273_v9 = vpack.c.bf16 %v1243_v3, %v1242_v7  ;;  %v1138_v23 = vadd.f32 %v2444_v52, %v2977_v44 }
 0x282   : > { %v1129_v59 = vpop.f32.mrf.mxu0 }
 0x283   : > { %v1272_v62 = vpack.c.bf16 %v1241_v55, %v1240_v54  ;;  %v1130_v5 = vadd.f32 %v2977_v44, %v1129_v59  ;;  %v1246_v24 = vmax.f32 %v1138_v23, 0.0 }
 0x284   : > { %v2445_v63 = vpop.f32.mrf.mxu0 }
 0x285   : > { %1429 = vmatmul.mubr.bf16.vlgmr.msra.gmra.mxu1 %v1272_v62  ;;  %v1244_v17 = vmax.f32 %v1130_v5, 0.0  ;;  %v1141_v19 = vadd.f32 %v2445_v63, %v2977_v44  ;;  %v2560_v5 = vld [vmem:[%s3279_s9] sm:$0xff]  }
 0x286   : > { %1438 = vmatprep.mubr.bf16.mxu1 %v2623_v42  ;;  %v1132_v4 = vpop.f32.mrf.mxu0  ;;  %2263 = vmatpush3.bf16.msra.mxu0 %v2560_v5 }
 0x287   : > { %v1133_v60 = vadd.f32 %v2977_v44, %v1132_v4  ;;  %v1247_v25 = vmax.f32 %v1141_v19, 0.0 }
 0x288   : > { %v2448_v10 = vpop.f32.mrf.mxu0 }
 0x289   : > { %v1245_v13 = vmax.f32 %v1133_v60, 0.0  ;;  %v1275_v26 = vpack.c.bf16 %v1247_v25, %v1246_v24  ;;  %v1154_v36 = vadd.f32 %v2448_v10, %v2977_v44 }
 0x28a   : > { %v1145_v14 = vpop.f32.mrf.mxu0 }
 0x28b   : > { %v1274_v20 = vpack.c.bf16 %v1245_v13, %v1244_v17  ;;  %v1146_v29 = vadd.f32 %v2977_v44, %v1145_v14  ;;  %v1250_v39 = vmax.f32 %v1154_v36, 0.0 }
 0x28c   : > { %v2449_v21 = vpop.f32.mrf.mxu0 }
 0x28d   : > { %1439 = vmatmul.mubr.bf16.gmra.mxu1 %v1273_v9  ;;  %v1248_v32 = vmax.f32 %v1146_v29, 0.0  ;;  %v1157_v33 = vadd.f32 %v2449_v21, %v2977_v44 }
 0x28e   : > { %1448 = vmatprep.mubr.bf16.mxu1 %v2623_v42  ;;  %v1148_v15 = vpop.f32.mrf.mxu0 }
 0x28f   : > { %v1149_v27 = vadd.f32 %v2977_v44, %v1148_v15  ;;  %v1251_v37 = vmax.f32 %v1157_v33, 0.0 }
 0x290   : > { %v2452_v28 = vpop.f32.mrf.mxu0 }
 0x291   : > { %v1249_v30 = vmax.f32 %v1149_v27, 0.0  ;;  %v1277_v40 = vpack.c.bf16 %v1251_v37, %v1250_v39  ;;  %v1170_v47 = vadd.f32 %v2452_v28, %v2977_v44 }
 0x292   : > { %v1161_v31 = vpop.f32.mrf.mxu0 }
 0x293   : > { %v1276_v34 = vpack.c.bf16 %v1249_v30, %v1248_v32  ;;  %v1162_v56 = vadd.f32 %v2977_v44, %v1161_v31  ;;  %v1254_v51 = vmax.f32 %v1170_v47, 0.0  ;;  %v1306_v47 = vlaneseq }
 0x294   : > { %v2453_v35 = vpop.f32.mrf.mxu0 }
 0x295   : > { %1449 = vmatmul.mubr.bf16.gmra.mxu1 %v1274_v20  ;;  %v1252_v43 = vmax.f32 %v1162_v56, 0.0  ;;  %v1173_v48 = vadd.f32 %v2453_v35, %v2977_v44 }
 0x296   : > { %1458 = vmatprep.mubr.bf16.mxu1 %v2623_v42  ;;  %v1164_v38 = vpop.f32.mrf.mxu0 }
 0x297   : > { %v1165_v41 = vadd.f32 %v2977_v44, %v1164_v38  ;;  %v1255_v52 = vmax.f32 %v1173_v48, 0.0  ;;  %v1307_v48 = vshrl.u32 %v1306_v47, 7 }
 0x298   : > { %v2456_v57 = vpop.f32.mrf.mxu0 }
 0x299   : > { %v1253_v45 = vmax.f32 %v1165_v41, 0.0  ;;  %v1279_v54 = vpack.c.bf16 %v1255_v52, %v1254_v51  ;;  %v1186_v0 = vadd.f32 %v2456_v57, %v2977_v44  ;;  %v1304_v51 = vld [vmem:[%s3278_s8] sm:$0x3] }
 0x29a   : > { %v1177_v46 = vpop.f32.mrf.mxu0 }
 0x29b   : > { %v1278_v49 = vpack.c.bf16 %v1253_v45, %v1252_v43  ;;  %v1178_v55 = vadd.f32 %v2977_v44, %v1177_v46  ;;  %v1258_v4 = vmax.f32 %v1186_v0, 0.0 }
 0x29c   : > { %v2457_v50 = vpop.f32.mrf.mxu0 }
 0x29d   : > { %1459 = vmatmul.mubr.bf16.gmra.mxu1 %v1275_v26  ;;  %v1256_v61 = vmax.f32 %v1178_v55, 0.0  ;;  %v1189_v1 = vadd.f32 %v2457_v50, %v2977_v44  ;;  %v1308_v50 = vsub.s32 0, %v1307_v48 }
 0x29e   : > { %1468 = vmatprep.mubr.bf16.mxu1 %v2623_v42  ;;  %v1180_v53 = vpop.f32.mrf.mxu0 }
 0x29f   : > { %v1181_v58 = vadd.f32 %v2977_v44, %v1180_v53  ;;  %v1259_v6 = vmax.f32 %v1189_v1, 0.0 }
 0x2a0   : > { %v2460_v59 = vpop.f32.mrf.mxu0 }
 0x2a1   : > { %v1257_v62 = vmax.f32 %v1181_v58, 0.0  ;;  %v1281_v8 = vpack.c.bf16 %v1259_v6, %v1258_v4  ;;  %v1202_v16 = vadd.f32 %v2460_v59, %v2977_v44 }
 0x2a2   : > { %v1193_v63 = vpop.f32.mrf.mxu0 }
 0x2a3   : > { %v1280_v2 = vpack.c.bf16 %v1257_v62, %v1256_v61  ;;  %v1194_v9 = vadd.f32 %v2977_v44, %v1193_v63  ;;  %v1262_v20 = vmax.f32 %v1202_v16, 0.0 }
 0x2a4   : > { %v2461_v3 = vpop.f32.mrf.mxu0 }
 0x2a5   : > { %1469 = vmatmul.mubr.bf16.gmra.mxu1 %v1276_v34  ;;  %v1260_v12 = vmax.f32 %v1194_v9, 0.0  ;;  %v1205_v17 = vadd.f32 %v2461_v3, %v2977_v44 }
 0x2a6   : > { %1478 = vmatprep.mubr.bf16.mxu1 %v2623_v42  ;;  %v1196_v7 = vpop.f32.mrf.mxu0 }
 0x2a7   : > { %v1197_v60 = vadd.f32 %v2977_v44, %v1196_v7  ;;  %v1263_v21 = vmax.f32 %v1205_v17, 0.0 }
 0x2a8   : > { %v2464_v10 = vpop.f32.mrf.mxu0 }
 0x2a9   : > { %v1261_v13 = vmax.f32 %v1197_v60, 0.0  ;;  %v1283_v23 = vpack.c.bf16 %v1263_v21, %v1262_v20  ;;  %v1218_v29 = vadd.f32 %v2464_v10, %v2977_v44 }
 0x2aa   : > { %v1209_v14 = vpop.f32.mrf.mxu0 }
 0x2ab   : > { %v1282_v18 = vpack.c.bf16 %v1261_v13, %v1260_v12  ;;  %v1210_v25 = vadd.f32 %v2977_v44, %v1209_v14  ;;  %v1266_v33 = vmax.f32 %v1218_v29, 0.0 }
 0x2ac   : > { %v2465_v19 = vpop.f32.mrf.mxu0 }
 0x2ad   : > { %1479 = vmatmul.mubr.bf16.gmra.mxu1 %v1277_v40  ;;  %v1264_v26 = vmax.f32 %v1210_v25, 0.0  ;;  %v1221_v30 = vadd.f32 %v2465_v19, %v2977_v44 }
 0x2ae   : > { %1488 = vmatprep.mubr.bf16.mxu1 %v2623_v42  ;;  %v1212_v22 = vpop.f32.mrf.mxu0 }
 0x2af   : > { %v1213_v15 = vadd.f32 %v2977_v44, %v1212_v22  ;;  %v1267_v34 = vmax.f32 %v1221_v30, 0.0 }
 0x2b0   : > { %v2468_v24 = vpop.f32.mrf.mxu0 }
 0x2b1   : > { %v1265_v27 = vmax.f32 %v1213_v15, 0.0  ;;  %v1285_v36 = vpack.c.bf16 %v1267_v34, %v1266_v33  ;;  %v1234_v56 = vadd.f32 %v2468_v24, %v2977_v44 }
 0x2b2   : > { %v1225_v28 = vpop.f32.mrf.mxu0 }
 0x2b3   : > { %v1284_v31 = vpack.c.bf16 %v1265_v27, %v1264_v26  ;;  %v1226_v37 = vadd.f32 %v2977_v44, %v1225_v28  ;;  %v1270_v43 = vmax.f32 %v1234_v56, 0.0 }
 0x2b4   : > { %v2469_v32 = vpop.f32.mrf.mxu0 }
 0x2b5   : > { %1489 = vmatmul.mubr.bf16.gmra.mxu1 %v1278_v49  ;;  %v1268_v39 = vmax.f32 %v1226_v37, 0.0  ;;  %v1237_v41 = vadd.f32 %v2469_v32, %v2977_v44  ;;  %v1312_v49 = vsub.s32 1, %v1307_v48 }
 0x2b6   : > { %1498 = vmatprep.mubr.bf16.mxu1 %v2623_v42  ;;  %v1228_v35 = vpop.f32.mrf.mxu0 }
 0x2b7   : > { %v1229_v38 = vadd.f32 %v2977_v44, %v1228_v35  ;;  %v1271_v45 = vmax.f32 %v1237_v41, 0.0  ;;  %v3077_v53 = vrot.slane %v1304_v51, %v1312_v49  ;;  %v3079_v44 = vrot.slane %v1304_v51, %v1308_v50 }
 0x2b9   : > { %v1269_v40 = vmax.f32 %v1229_v38, 0.0  ;;  %v1287_v46 = vpack.c.bf16 %v1271_v45, %v1270_v43 }
 0x2bb   : > { %v1286_v57 = vpack.c.bf16 %v1269_v40, %v1268_v39 }
 0x2bd   : > { %1499 = vmatmul.mubr.bf16.gmra.mxu1 %v1279_v54 }
 0x2be   : > { %1508 = vmatprep.mubr.bf16.mxu1 %v2623_v42 }
 0x2c5   : > { %1509 = vmatmul.mubr.bf16.gmra.mxu1 %v1280_v2 }
 0x2c6   : > { %1518 = vmatprep.mubr.bf16.mxu1 %v2623_v42 }
 0x2cd   : > { %1519 = vmatmul.mubr.bf16.gmra.mxu1 %v1281_v8 }
 0x2ce   : > { %1528 = vmatprep.mubr.bf16.mxu1 %v2623_v42 }
 0x2d5   : > { %1529 = vmatmul.mubr.bf16.gmra.mxu1 %v1282_v18 }
 0x2d6   : > { %1538 = vmatprep.mubr.bf16.mxu1 %v2623_v42 }
 0x2dd   : > { %1539 = vmatmul.mubr.bf16.gmra.mxu1 %v1283_v23 }
 0x2de   : > { %1548 = vmatprep.mubr.bf16.mxu1 %v2623_v42 }
 0x2e5   : > { %1549 = vmatmul.mubr.bf16.gmra.mxu1 %v1284_v31 }
 0x2e6   : > { %1558 = vmatprep.mubr.bf16.mxu1 %v2623_v42 }
 0x2ed   : > { %1559 = vmatmul.mubr.bf16.gmra.mxu1 %v1285_v36 }
 0x2ee   : > { %1568 = vmatprep.mubr.bf16.mxu1 %v2623_v42 }
 0x2f5   : > { %1569 = vmatmul.mubr.bf16.gmra.mxu1 %v1286_v57 }
 0x2f6   : > { %1578 = vmatprep.mubr.bf16.mxu1 %v2623_v42 }
 0x2fd   : > { %1579 = vmatmul.mubr.bf16.gmra.mxu1 %v1287_v46 }
 0x345   : > { %v1430_v52 = vpop.f32.mrf.mxu1 }
 0x346   : > { %v1431_v59 = vadd.f32 %v1430_v52, %v3079_v44 }
 0x347   : > { %v1432_v54 = vpop.f32.mrf.mxu1 }
 0x348   : > { %v1433_v42 = vadd.f32 %v1432_v54, %v3077_v53  ;;  %v1589_v3 = vmax.f32 %v1431_v59, 0.0 }
 0x349   : > { %v1434_v55 = vpop.f32.mrf.mxu1 }
 0x34a   : > { %v1435_v58 = vadd.f32 %v1434_v55, %v3079_v44  ;;  %v1590_v1 = vmax.f32 %v1433_v42, 0.0 }
 0x34b   : > { %v1436_v61 = vpop.f32.mrf.mxu1 }
 0x34c   : > { %v1437_v62 = vadd.f32 %v1436_v61, %v3077_v53  ;;  %v1591_v63 = vmax.f32 %v1435_v58, 0.0 }
 0x34d   : > { %v1440_v0 = vpop.f32.mrf.mxu1 }
 0x34e   : > { %v1592_v2 = vmax.f32 %v1437_v62, 0.0  ;;  %v1653_v7 = vpack.c.bf16 %v1591_v63, %v1589_v3  ;;  %v1441_v10 = vadd.f32 %v1440_v0, %v3079_v44 }
 0x34f   : > { %v1442_v4 = vpop.f32.mrf.mxu1 }
 0x350   : > { %v1654_v6 = vpack.c.bf16 %v1592_v2, %v1590_v1  ;;  %v1443_v9 = vadd.f32 %v1442_v4, %v3077_v53  ;;  %v1593_v17 = vmax.f32 %v1441_v10, 0.0 }
 0x351   : > { %v1444_v8 = vpop.f32.mrf.mxu1 }
 0x352   : > { %v1445_v60 = vadd.f32 %v1444_v8, %v3079_v44  ;;  %1852 = vmatprep.mubr.bf16.mxu0 %v1654_v6  ;;  %v1594_v14 = vmax.f32 %v1443_v9, 0.0 }
 0x353   : > { %v1446_v11 = vpop.f32.mrf.mxu1  ;;  %1853 = vmatmul.mubr.bf16.vlgmr.msra.gmra.mxu0 %v1653_v7 }
 0x354   : > { %v1447_v5 = vadd.f32 %v1446_v11, %v3077_v53  ;;  %v1595_v12 = vmax.f32 %v1445_v60, 0.0 }
 0x355   : > { %v1450_v13 = vpop.f32.mrf.mxu1 }
 0x356   : > { %v1596_v16 = vmax.f32 %v1447_v5, 0.0  ;;  %v1655_v20 = vpack.c.bf16 %v1595_v12, %v1593_v17  ;;  %v1451_v25 = vadd.f32 %v1450_v13, %v3079_v44 }
 0x357   : > { %v1452_v18 = vpop.f32.mrf.mxu1 }
 0x358   : > { %v1656_v19 = vpack.c.bf16 %v1596_v16, %v1594_v14  ;;  %v1453_v22 = vadd.f32 %v1452_v18, %v3077_v53  ;;  %v1597_v30 = vmax.f32 %v1451_v25, 0.0 }
 0x359   : > { %v1454_v21 = vpop.f32.mrf.mxu1 }
 0x35a   : > { %v1455_v23 = vadd.f32 %v1454_v21, %v3079_v44  ;;  %1860 = vmatprep.mubr.bf16.mxu0 %v1656_v19  ;;  %v1598_v28 = vmax.f32 %v1453_v22, 0.0 }
 0x35b   : > { %v1456_v15 = vpop.f32.mrf.mxu1  ;;  %1861 = vmatmul.mubr.bf16.gmra.mxu0 %v1655_v20 }
 0x35c   : > { %v1457_v24 = vadd.f32 %v1456_v15, %v3077_v53  ;;  %v1599_v26 = vmax.f32 %v1455_v23, 0.0 }
 0x35d   : > { %v1460_v27 = vpop.f32.mrf.mxu1 }
 0x35e   : > { %v1600_v29 = vmax.f32 %v1457_v24, 0.0  ;;  %v1657_v33 = vpack.c.bf16 %v1599_v26, %v1597_v30  ;;  %v1461_v37 = vadd.f32 %v1460_v27, %v3079_v44 }
 0x35f   : > { %v1462_v31 = vpop.f32.mrf.mxu1 }
 0x360   : > { %v1658_v32 = vpack.c.bf16 %v1600_v29, %v1598_v28  ;;  %v1463_v35 = vadd.f32 %v1462_v31, %v3077_v53  ;;  %v1601_v43 = vmax.f32 %v1461_v37, 0.0 }
 0x361   : > { %v1464_v34 = vpop.f32.mrf.mxu1 }
 0x362   : > { %v1465_v36 = vadd.f32 %v1464_v34, %v3079_v44  ;;  %1868 = vmatprep.mubr.bf16.mxu0 %v1658_v32  ;;  %v1602_v41 = vmax.f32 %v1463_v35, 0.0 }
 0x363   : > { %v1466_v38 = vpop.f32.mrf.mxu1  ;;  %1869 = vmatmul.mubr.bf16.gmra.mxu0 %v1657_v33 }
 0x364   : > { %v1467_v39 = vadd.f32 %v1466_v38, %v3077_v53  ;;  %v1603_v40 = vmax.f32 %v1465_v36, 0.0 }
 0x365   : > { %v1470_v56 = vpop.f32.mrf.mxu1 }
 0x366   : > { %v1604_v57 = vmax.f32 %v1467_v39, 0.0  ;;  %v1659_v47 = vpack.c.bf16 %v1603_v40, %v1601_v43  ;;  %v1471_v51 = vadd.f32 %v1470_v56, %v3079_v44 }
 0x367   : > { %v1472_v45 = vpop.f32.mrf.mxu1 }
 0x368   : > { %v1660_v46 = vpack.c.bf16 %v1604_v57, %v1602_v41  ;;  %v1473_v49 = vadd.f32 %v1472_v45, %v3077_v53  ;;  %v1605_v61 = vmax.f32 %v1471_v51, 0.0 }
 0x369   : > { %v1474_v48 = vpop.f32.mrf.mxu1 }
 0x36a   : > { %v1475_v50 = vadd.f32 %v1474_v48, %v3079_v44  ;;  %1876 = vmatprep.mubr.bf16.mxu0 %v1660_v46  ;;  %v1606_v58 = vmax.f32 %v1473_v49, 0.0 }
 0x36b   : > { %v1476_v52 = vpop.f32.mrf.mxu1  ;;  %1877 = vmatmul.mubr.bf16.gmra.mxu0 %v1659_v47 }
 0x36c   : > { %v1477_v54 = vadd.f32 %v1476_v52, %v3077_v53  ;;  %v1607_v55 = vmax.f32 %v1475_v50, 0.0 }
 0x36d   : > { %v1480_v42 = vpop.f32.mrf.mxu1 }
 0x36e   : > { %v1608_v59 = vmax.f32 %v1477_v54, 0.0  ;;  %v1661_v0 = vpack.c.bf16 %v1607_v55, %v1605_v61  ;;  %v1481_v4 = vadd.f32 %v1480_v42, %v3079_v44 }
 0x36f   : > { %v1482_v62 = vpop.f32.mrf.mxu1 }
 0x370   : > { %v1662_v63 = vpack.c.bf16 %v1608_v59, %v1606_v58  ;;  %v1483_v2 = vadd.f32 %v1482_v62, %v3077_v53  ;;  %v1609_v11 = vmax.f32 %v1481_v4, 0.0 }
 0x371   : > { %v1484_v1 = vpop.f32.mrf.mxu1 }
 0x372   : > { %v1485_v3 = vadd.f32 %v1484_v1, %v3079_v44  ;;  %1884 = vmatprep.mubr.bf16.mxu0 %v1662_v63  ;;  %v1610_v60 = vmax.f32 %v1483_v2, 0.0 }
 0x373   : > { %v1486_v6 = vpop.f32.mrf.mxu1  ;;  %1885 = vmatmul.mubr.bf16.gmra.mxu0 %v1661_v0 }
 0x374   : > { %v1487_v7 = vadd.f32 %v1486_v6, %v3077_v53  ;;  %v1611_v8 = vmax.f32 %v1485_v3, 0.0 }
 0x375   : > { %v1490_v9 = vpop.f32.mrf.mxu1 }
 0x376   : > { %v1612_v10 = vmax.f32 %v1487_v7, 0.0  ;;  %v1663_v13 = vpack.c.bf16 %v1611_v8, %v1609_v11  ;;  %v1491_v18 = vadd.f32 %v1490_v9, %v3079_v44 }
 0x377   : > { %v1492_v5 = vpop.f32.mrf.mxu1 }
 0x378   : > { %v1664_v12 = vpack.c.bf16 %v1612_v10, %v1610_v60  ;;  %v1493_v16 = vadd.f32 %v1492_v5, %v3077_v53  ;;  %v1613_v15 = vmax.f32 %v1491_v18, 0.0 }
 0x379   : > { %v1494_v14 = vpop.f32.mrf.mxu1 }
 0x37a   : > { %v1495_v17 = vadd.f32 %v1494_v14, %v3079_v44  ;;  %1892 = vmatprep.mubr.bf16.mxu0 %v1664_v12  ;;  %v1614_v23 = vmax.f32 %v1493_v16, 0.0 }
 0x37b   : > { %v1496_v19 = vpop.f32.mrf.mxu1  ;;  %1893 = vmatmul.mubr.bf16.gmra.mxu0 %v1663_v13 }
 0x37c   : > { %v1497_v20 = vadd.f32 %v1496_v19, %v3077_v53  ;;  %v1615_v21 = vmax.f32 %v1495_v17, 0.0 }
 0x37d   : > { %v1500_v22 = vpop.f32.mrf.mxu1 }
 0x37e   : > { %v1616_v25 = vmax.f32 %v1497_v20, 0.0  ;;  %v1665_v27 = vpack.c.bf16 %v1615_v21, %v1613_v15  ;;  %v1501_v31 = vadd.f32 %v1500_v22, %v3079_v44 }
 0x37f   : > { %v1502_v24 = vpop.f32.mrf.mxu1 }
 0x380   : > { %v1666_v26 = vpack.c.bf16 %v1616_v25, %v1614_v23  ;;  %v1503_v29 = vadd.f32 %v1502_v24, %v3077_v53  ;;  %v1617_v38 = vmax.f32 %v1501_v31, 0.0 }
 0x381   : > { %v1504_v28 = vpop.f32.mrf.mxu1 }
 0x382   : > { %v1505_v30 = vadd.f32 %v1504_v28, %v3079_v44  ;;  %1900 = vmatprep.mubr.bf16.mxu0 %v1666_v26  ;;  %v1618_v36 = vmax.f32 %v1503_v29, 0.0 }
 0x383   : > { %v1506_v32 = vpop.f32.mrf.mxu1  ;;  %1901 = vmatmul.mubr.bf16.gmra.mxu0 %v1665_v27 }
 0x384   : > { %v1507_v33 = vadd.f32 %v1506_v32, %v3077_v53  ;;  %v1619_v34 = vmax.f32 %v1505_v30, 0.0 }
 0x385   : > { %v1510_v35 = vpop.f32.mrf.mxu1 }
 0x386   : > { %v1620_v37 = vmax.f32 %v1507_v33, 0.0  ;;  %v1667_v56 = vpack.c.bf16 %v1619_v34, %v1617_v38  ;;  %v1511_v45 = vadd.f32 %v1510_v35, %v3079_v44 }
 0x387   : > { %v1512_v39 = vpop.f32.mrf.mxu1 }
 0x388   : > { %v1668_v40 = vpack.c.bf16 %v1620_v37, %v1618_v36  ;;  %v1513_v57 = vadd.f32 %v1512_v39, %v3077_v53  ;;  %v1621_v52 = vmax.f32 %v1511_v45, 0.0 }
 0x389   : > { %v1514_v41 = vpop.f32.mrf.mxu1 }
 0x38a   : > { %v1515_v43 = vadd.f32 %v1514_v41, %v3079_v44  ;;  %1908 = vmatprep.mubr.bf16.mxu0 %v1668_v40  ;;  %v1622_v50 = vmax.f32 %v1513_v57, 0.0 }
 0x38b   : > { %v1516_v46 = vpop.f32.mrf.mxu1  ;;  %1909 = vmatmul.mubr.bf16.gmra.mxu0 %v1667_v56 }
 0x38c   : > { %v1517_v47 = vadd.f32 %v1516_v46, %v3077_v53  ;;  %v1623_v48 = vmax.f32 %v1515_v43, 0.0 }
 0x38d   : > { %v1520_v49 = vpop.f32.mrf.mxu1 }
 0x38e   : > { %v1624_v51 = vmax.f32 %v1517_v47, 0.0  ;;  %v1669_v42 = vpack.c.bf16 %v1623_v48, %v1621_v52  ;;  %v1521_v62 = vadd.f32 %v1520_v49, %v3079_v44 }
 0x38f   : > { %v1522_v54 = vpop.f32.mrf.mxu1 }
 0x390   : > { %v1670_v55 = vpack.c.bf16 %v1624_v51, %v1622_v50  ;;  %v1523_v59 = vadd.f32 %v1522_v54, %v3077_v53  ;;  %v1625_v6 = vmax.f32 %v1521_v62, 0.0 }
 0x391   : > { %v1524_v58 = vpop.f32.mrf.mxu1 }
 0x392   : > { %v1525_v61 = vadd.f32 %v1524_v58, %v3079_v44  ;;  %1916 = vmatprep.mubr.bf16.mxu0 %v1670_v55  ;;  %v1626_v3 = vmax.f32 %v1523_v59, 0.0 }
 0x393   : > { %v1526_v63 = vpop.f32.mrf.mxu1  ;;  %1917 = vmatmul.mubr.bf16.gmra.mxu0 %v1669_v42 }
 0x394   : > { %v1527_v0 = vadd.f32 %v1526_v63, %v3077_v53  ;;  %v1627_v1 = vmax.f32 %v1525_v61, 0.0 }
 0x395   : > { %v1530_v2 = vpop.f32.mrf.mxu1 }
 0x396   : > { %v1628_v4 = vmax.f32 %v1527_v0, 0.0  ;;  %v1671_v9 = vpack.c.bf16 %v1627_v1, %v1625_v6  ;;  %v1531_v5 = vadd.f32 %v1530_v2, %v3079_v44 }
 0x397   : > { %v1532_v7 = vpop.f32.mrf.mxu1 }
 0x398   : > { %v1672_v8 = vpack.c.bf16 %v1628_v4, %v1626_v3  ;;  %v1533_v10 = vadd.f32 %v1532_v7, %v3077_v53  ;;  %v1629_v19 = vmax.f32 %v1531_v5, 0.0 }
 0x399   : > { %v1534_v60 = vpop.f32.mrf.mxu1 }
 0x39a   : > { %v1535_v11 = vadd.f32 %v1534_v60, %v3079_v44  ;;  %1924 = vmatprep.mubr.bf16.mxu0 %v1672_v8  ;;  %v1630_v17 = vmax.f32 %v1533_v10, 0.0 }
 0x39b   : > { %v1536_v12 = vpop.f32.mrf.mxu1  ;;  %1925 = vmatmul.mubr.bf16.gmra.mxu0 %v1671_v9 }
 0x39c   : > { %v1537_v13 = vadd.f32 %v1536_v12, %v3077_v53  ;;  %v1631_v14 = vmax.f32 %v1535_v11, 0.0 }
 0x39d   : > { %v1540_v16 = vpop.f32.mrf.mxu1 }
 0x39e   : > { %v1632_v18 = vmax.f32 %v1537_v13, 0.0  ;;  %v1673_v22 = vpack.c.bf16 %v1631_v14, %v1629_v19  ;;  %v1541_v24 = vadd.f32 %v1540_v16, %v3079_v44 }
 0x39f   : > { %v1542_v20 = vpop.f32.mrf.mxu1 }
 0x3a0   : > { %v1674_v21 = vpack.c.bf16 %v1632_v18, %v1630_v17  ;;  %v1543_v25 = vadd.f32 %v1542_v20, %v3077_v53  ;;  %v1633_v32 = vmax.f32 %v1541_v24, 0.0 }
 0x3a1   : > { %v1544_v23 = vpop.f32.mrf.mxu1 }
 0x3a2   : > { %v1545_v15 = vadd.f32 %v1544_v23, %v3079_v44  ;;  %1932 = vmatprep.mubr.bf16.mxu0 %v1674_v21  ;;  %v1634_v30 = vmax.f32 %v1543_v25, 0.0 }
 0x3a3   : > { %v1546_v26 = vpop.f32.mrf.mxu1  ;;  %1933 = vmatmul.mubr.bf16.gmra.mxu0 %v1673_v22 }
 0x3a4   : > { %v1547_v27 = vadd.f32 %v1546_v26, %v3077_v53  ;;  %v1635_v28 = vmax.f32 %v1545_v15, 0.0 }
 0x3a5   : > { %v1550_v29 = vpop.f32.mrf.mxu1 }
 0x3a6   : > { %v1636_v31 = vmax.f32 %v1547_v27, 0.0  ;;  %v1675_v35 = vpack.c.bf16 %v1635_v28, %v1633_v32  ;;  %v1551_v39 = vadd.f32 %v1550_v29, %v3079_v44 }
 0x3a7   : > { %v1552_v33 = vpop.f32.mrf.mxu1 }
 0x3a8   : > { %v1676_v34 = vpack.c.bf16 %v1636_v31, %v1634_v30  ;;  %v1553_v37 = vadd.f32 %v1552_v33, %v3077_v53  ;;  %v1637_v46 = vmax.f32 %v1551_v39, 0.0 }
 0x3a9   : > { %v1554_v36 = vpop.f32.mrf.mxu1 }
 0x3aa   : > { %v1555_v38 = vadd.f32 %v1554_v36, %v3079_v44  ;;  %1940 = vmatprep.mubr.bf16.mxu0 %v1676_v34  ;;  %v1638_v43 = vmax.f32 %v1553_v37, 0.0 }
 0x3ab   : > { %v1556_v40 = vpop.f32.mrf.mxu1  ;;  %1941 = vmatmul.mubr.bf16.gmra.mxu0 %v1675_v35 }
 0x3ac   : > { %v1557_v56 = vadd.f32 %v1556_v40, %v3077_v53  ;;  %v1639_v41 = vmax.f32 %v1555_v38, 0.0 }
 0x3ad   : > { %v1560_v57 = vpop.f32.mrf.mxu1 }
 0x3ae   : > { %v1640_v45 = vmax.f32 %v1557_v56, 0.0  ;;  %v1677_v49 = vpack.c.bf16 %v1639_v41, %v1637_v46  ;;  %v1561_v54 = vadd.f32 %v1560_v57, %v3079_v44 }
 0x3af   : > { %v1562_v47 = vpop.f32.mrf.mxu1 }
 0x3b0   : > { %v1678_v48 = vpack.c.bf16 %v1640_v45, %v1638_v43  ;;  %v1563_v51 = vadd.f32 %v1562_v47, %v3077_v53  ;;  %v1641_v63 = vmax.f32 %v1561_v54, 0.0 }
 0x3b1   : > { %v1564_v50 = vpop.f32.mrf.mxu1 }
 0x3b2   : > { %v1565_v52 = vadd.f32 %v1564_v50, %v3079_v44  ;;  %1948 = vmatprep.mubr.bf16.mxu0 %v1678_v48  ;;  %v1642_v61 = vmax.f32 %v1563_v51, 0.0 }
 0x3b3   : > { %v1566_v55 = vpop.f32.mrf.mxu1  ;;  %1949 = vmatmul.mubr.bf16.gmra.mxu0 %v1677_v49 }
 0x3b4   : > { %v1567_v42 = vadd.f32 %v1566_v55, %v3077_v53  ;;  %v1643_v58 = vmax.f32 %v1565_v52, 0.0 }
 0x3b5   : > { %v1570_v59 = vpop.f32.mrf.mxu1 }
 0x3b6   : > { %v1644_v62 = vmax.f32 %v1567_v42, 0.0  ;;  %v1679_v2 = vpack.c.bf16 %v1643_v58, %v1641_v63  ;;  %v1571_v7 = vadd.f32 %v1570_v59, %v3079_v44 }
 0x3b7   : > { %v1572_v0 = vpop.f32.mrf.mxu1 }
 0x3b8   : > { %v1680_v1 = vpack.c.bf16 %v1644_v62, %v1642_v61  ;;  %v1573_v4 = vadd.f32 %v1572_v0, %v3077_v53  ;;  %v1645_v12 = vmax.f32 %v1571_v7, 0.0 }
 0x3b9   : > { %v1574_v3 = vpop.f32.mrf.mxu1 }
 0x3ba   : > { %v1575_v6 = vadd.f32 %v1574_v3, %v3079_v44  ;;  %1956 = vmatprep.mubr.bf16.mxu0 %v1680_v1  ;;  %v1646_v11 = vmax.f32 %v1573_v4, 0.0 }
 0x3bb   : > { %v1576_v8 = vpop.f32.mrf.mxu1  ;;  %1957 = vmatmul.mubr.bf16.gmra.mxu0 %v1679_v2 }
 0x3bc   : > { %v1577_v9 = vadd.f32 %v1576_v8, %v3077_v53  ;;  %v1647_v60 = vmax.f32 %v1575_v6, 0.0 }
 0x3bd   : > { %v1580_v10 = vpop.f32.mrf.mxu1 }
 0x3be   : > { %v1648_v5 = vmax.f32 %v1577_v9, 0.0  ;;  %v1681_v16 = vpack.c.bf16 %v1647_v60, %v1645_v12  ;;  %v1581_v20 = vadd.f32 %v1580_v10, %v3079_v44 }
 0x3bf   : > { %v1582_v13 = vpop.f32.mrf.mxu1 }
 0x3c0   : > { %v1682_v14 = vpack.c.bf16 %v1648_v5, %v1646_v11  ;;  %v1583_v18 = vadd.f32 %v1582_v13, %v3077_v53  ;;  %v1649_v24 = vmax.f32 %v1581_v20, 0.0 }
 0x3c1   : > { %v1584_v17 = vpop.f32.mrf.mxu1 }
 0x3c2   : > { %v1585_v19 = vadd.f32 %v1584_v17, %v3079_v44  ;;  %1964 = vmatprep.mubr.bf16.mxu0 %v1682_v14  ;;  %v1650_v25 = vmax.f32 %v1583_v18, 0.0  ;;  %v3151_v44 = vld [vmem:[%s3280_s10] ss:$0 sm:$0xff] }
 0x3c3   : > { %v1586_v21 = vpop.f32.mrf.mxu1  ;;  %1965 = vmatmul.mubr.bf16.gmra.mxu0 %v1681_v16 }
 0x3c4   : > { %v1587_v22 = vadd.f32 %v1586_v21, %v3077_v53  ;;  %v1651_v23 = vmax.f32 %v1585_v19, 0.0 }
 0x3c6   : > { %v1652_v15 = vmax.f32 %v1587_v22, 0.0  ;;  %v1683_v27 = vpack.c.bf16 %v1651_v23, %v1649_v24 }
 0x3c8   : > { %v1684_v26 = vpack.c.bf16 %v1652_v15, %v1650_v25 }
 0x3ca   : > { %1972 = vmatprep.mubr.bf16.mxu0 %v1684_v26 }
 0x3cb   : > { %1973 = vmatmul.mubr.bf16.gmra.mxu0 %v1683_v27 }
 0x413   : > { %v2264_v28 = vpop.f32.mrf.mxu0 }
 0x415   : > { %v2265_v29 = vpop.f32.mrf.mxu0 }
 0x416   : > { %v2266_v30 = vadd.f32 %v2265_v29, %v2264_v28 }
 0x417   : > { %v2267_v53 = vpop.f32.mrf.mxu0 }
 0x418   : > { %v1855_v31 = vadd.f32 %v2266_v30, %v3151_v44 }
 0x419   : > { %v2268_v32 = vpop.f32.mrf.mxu0 }
 0x41a   : > { %1981 = vst [vmem:[%s3154_s15] sm:$0xff] %v1855_v31  ;;  %v2269_v33 = vadd.f32 %v2268_v32, %v2267_v53 }
 0x41b   : > { %v2270_v34 = vpop.f32.mrf.mxu0 }
 0x41c   : > { %v1858_v35 = vadd.f32 %v2269_v33, %v3151_v44 }
 0x41d   : > { %v2271_v36 = vpop.f32.mrf.mxu0 }
 0x41e   : > { %1982 = vst [vmem:[%s3154_s15 + $0x8] sm:$0xff] %v1858_v35  ;;  %v2272_v37 = vadd.f32 %v2271_v36, %v2270_v34 }
 0x41f   : > { %v2273_v38 = vpop.f32.mrf.mxu0 }
 0x420   : > { %v1863_v39 = vadd.f32 %v2272_v37, %v3151_v44 }
 0x421   : > { %v2274_v40 = vpop.f32.mrf.mxu0 }
 0x422   : > { %1983 = vst [vmem:[%s3154_s15 + $0x10] sm:$0xff] %v1863_v39  ;;  %v2275_v56 = vadd.f32 %v2274_v40, %v2273_v38 }
 0x423   : > { %v2276_v41 = vpop.f32.mrf.mxu0 }
 0x424   : > { %v1866_v57 = vadd.f32 %v2275_v56, %v3151_v44 }
 0x425   : > { %v2277_v43 = vpop.f32.mrf.mxu0 }
 0x426   : > { %1984 = vst [vmem:[%s3154_s15 + $0x18] sm:$0xff] %v1866_v57  ;;  %v2278_v45 = vadd.f32 %v2277_v43, %v2276_v41 }
 0x427   : > { %v2279_v46 = vpop.f32.mrf.mxu0 }
 0x428   : > { %v1871_v47 = vadd.f32 %v2278_v45, %v3151_v44 }
 0x429   : > { %v2280_v48 = vpop.f32.mrf.mxu0 }
 0x42a   : > { %1985 = vst [vmem:[%s3154_s15 + $0x20] sm:$0xff] %v1871_v47  ;;  %v2281_v49 = vadd.f32 %v2280_v48, %v2279_v46 }
 0x42b   : > { %v2282_v50 = vpop.f32.mrf.mxu0 }
 0x42c   : > { %v1874_v51 = vadd.f32 %v2281_v49, %v3151_v44 }
 0x42d   : > { %v2283_v52 = vpop.f32.mrf.mxu0 }
 0x42e   : > { %1986 = vst [vmem:[%s3154_s15 + $0x28] sm:$0xff] %v1874_v51  ;;  %v2284_v54 = vadd.f32 %v2283_v52, %v2282_v50 }
 0x42f   : > { %v2285_v55 = vpop.f32.mrf.mxu0 }
 0x430   : > { %v1879_v42 = vadd.f32 %v2284_v54, %v3151_v44 }
 0x431   : > { %v2286_v58 = vpop.f32.mrf.mxu0 }
 0x432   : > { %1987 = vst [vmem:[%s3154_s15 + $0x30] sm:$0xff] %v1879_v42  ;;  %v2287_v59 = vadd.f32 %v2286_v58, %v2285_v55 }
 0x433   : > { %v2288_v61 = vpop.f32.mrf.mxu0 }
 0x434   : > { %v1882_v62 = vadd.f32 %v2287_v59, %v3151_v44 }
 0x435   : > { %v2289_v63 = vpop.f32.mrf.mxu0 }
 0x436   : > { %1988 = vst [vmem:[%s3154_s15 + $0x38] sm:$0xff] %v1882_v62  ;;  %v2290_v0 = vadd.f32 %v2289_v63, %v2288_v61 }
 0x437   : > { %v2291_v1 = vpop.f32.mrf.mxu0 }
 0x438   : > { %v1887_v2 = vadd.f32 %v2290_v0, %v3151_v44 }
 0x439   : > { %v2292_v3 = vpop.f32.mrf.mxu0 }
 0x43a   : > { %1989 = vst [vmem:[%s3154_s15 + $0x40] sm:$0xff] %v1887_v2  ;;  %v2293_v4 = vadd.f32 %v2292_v3, %v2291_v1 }
 0x43b   : > { %v2294_v6 = vpop.f32.mrf.mxu0 }
 0x43c   : > { %v1890_v7 = vadd.f32 %v2293_v4, %v3151_v44 }
 0x43d   : > { %v2295_v8 = vpop.f32.mrf.mxu0 }
 0x43e   : > { %1990 = vst [vmem:[%s3154_s15 + $0x48] sm:$0xff] %v1890_v7  ;;  %v2296_v9 = vadd.f32 %v2295_v8, %v2294_v6 }
 0x43f   : > { %v2297_v60 = vpop.f32.mrf.mxu0 }
 0x440   : > { %v1895_v10 = vadd.f32 %v2296_v9, %v3151_v44 }
 0x441   : > { %v2298_v11 = vpop.f32.mrf.mxu0 }
 0x442   : > { %1991 = vst [vmem:[%s3154_s15 + $0x50] sm:$0xff] %v1895_v10  ;;  %v2299_v5 = vadd.f32 %v2298_v11, %v2297_v60 }
 0x443   : > { %v2300_v12 = vpop.f32.mrf.mxu0 }
 0x444   : > { %v1898_v13 = vadd.f32 %v2299_v5, %v3151_v44 }
 0x445   : > { %v2301_v14 = vpop.f32.mrf.mxu0 }
 0x446   : > { %1992 = vst [vmem:[%s3154_s15 + $0x58] sm:$0xff] %v1898_v13  ;;  %v2302_v16 = vadd.f32 %v2301_v14, %v2300_v12 }
 0x447   : > { %v2303_v17 = vpop.f32.mrf.mxu0 }
 0x448   : > { %v1903_v18 = vadd.f32 %v2302_v16, %v3151_v44 }
 0x449   : > { %v2304_v19 = vpop.f32.mrf.mxu0 }
 0x44a   : > { %1993 = vst [vmem:[%s3154_s15 + $0x60] sm:$0xff] %v1903_v18  ;;  %v2305_v20 = vadd.f32 %v2304_v19, %v2303_v17 }
 0x44b   : > { %v2306_v21 = vpop.f32.mrf.mxu0 }
 0x44c   : > { %v1906_v22 = vadd.f32 %v2305_v20, %v3151_v44 }
 0x44d   : > { %v2307_v23 = vpop.f32.mrf.mxu0 }
 0x44e   : > { %1994 = vst [vmem:[%s3154_s15 + $0x68] sm:$0xff] %v1906_v22  ;;  %v2308_v25 = vadd.f32 %v2307_v23, %v2306_v21 }
 0x44f   : > { %v2309_v15 = vpop.f32.mrf.mxu0 }
 0x450   : > { %v1911_v24 = vadd.f32 %v2308_v25, %v3151_v44 }
 0x451   : > { %v2310_v26 = vpop.f32.mrf.mxu0 }
 0x452   : > { %1995 = vst [vmem:[%s3154_s15 + $0x70] sm:$0xff] %v1911_v24  ;;  %v2311_v27 = vadd.f32 %v2310_v26, %v2309_v15 }
 0x453   : > { %v2312_v28 = vpop.f32.mrf.mxu0 }
 0x454   : > { %v1914_v29 = vadd.f32 %v2311_v27, %v3151_v44 }
 0x455   : > { %v2313_v30 = vpop.f32.mrf.mxu0 }
 0x456   : > { %1996 = vst [vmem:[%s3154_s15 + $0x78] sm:$0xff] %v1914_v29  ;;  %v2314_v53 = vadd.f32 %v2313_v30, %v2312_v28 }
 0x457   : > { %v2315_v31 = vpop.f32.mrf.mxu0 }
 0x458   : > { %v1919_v32 = vadd.f32 %v2314_v53, %v3151_v44 }
 0x459   : > { %v2316_v33 = vpop.f32.mrf.mxu0 }
 0x45a   : > { %1997 = vst [vmem:[%s3154_s15 + $0x80] sm:$0xff] %v1919_v32  ;;  %v2317_v34 = vadd.f32 %v2316_v33, %v2315_v31 }
 0x45b   : > { %v2318_v35 = vpop.f32.mrf.mxu0 }
 0x45c   : > { %v1922_v36 = vadd.f32 %v2317_v34, %v3151_v44 }
 0x45d   : > { %v2319_v37 = vpop.f32.mrf.mxu0 }
 0x45e   : > { %1998 = vst [vmem:[%s3154_s15 + $0x88] sm:$0xff] %v1922_v36  ;;  %v2320_v38 = vadd.f32 %v2319_v37, %v2318_v35 }
 0x45f   : > { %v2321_v39 = vpop.f32.mrf.mxu0 }
 0x460   : > { %v1927_v40 = vadd.f32 %v2320_v38, %v3151_v44 }
 0x461   : > { %v2322_v56 = vpop.f32.mrf.mxu0 }
 0x462   : > { %1999 = vst [vmem:[%s3154_s15 + $0x90] sm:$0xff] %v1927_v40  ;;  %v2323_v41 = vadd.f32 %v2322_v56, %v2321_v39 }
 0x463   : > { %v2324_v57 = vpop.f32.mrf.mxu0 }
 0x464   : > { %v1930_v43 = vadd.f32 %v2323_v41, %v3151_v44 }
 0x465   : > { %v2325_v45 = vpop.f32.mrf.mxu0 }
 0x466   : > { %2000 = vst [vmem:[%s3154_s15 + $0x98] sm:$0xff] %v1930_v43  ;;  %v2326_v46 = vadd.f32 %v2325_v45, %v2324_v57 }
 0x467   : > { %v2327_v47 = vpop.f32.mrf.mxu0 }
 0x468   : > { %v1935_v48 = vadd.f32 %v2326_v46, %v3151_v44 }
 0x469   : > { %v2328_v49 = vpop.f32.mrf.mxu0 }
 0x46a   : > { %2001 = vst [vmem:[%s3154_s15 + $0xa0] sm:$0xff] %v1935_v48  ;;  %v2329_v50 = vadd.f32 %v2328_v49, %v2327_v47 }
 0x46b   : > { %v2330_v51 = vpop.f32.mrf.mxu0 }
 0x46c   : > { %v1938_v52 = vadd.f32 %v2329_v50, %v3151_v44 }
 0x46d   : > { %v2331_v54 = vpop.f32.mrf.mxu0 }
 0x46e   : > { %2002 = vst [vmem:[%s3154_s15 + $0xa8] sm:$0xff] %v1938_v52  ;;  %v2332_v55 = vadd.f32 %v2331_v54, %v2330_v51 }
 0x46f   : > { %v2333_v42 = vpop.f32.mrf.mxu0 }
 0x470   : > { %v1943_v58 = vadd.f32 %v2332_v55, %v3151_v44 }
 0x471   : > { %v2334_v59 = vpop.f32.mrf.mxu0 }
 0x472   : > { %2003 = vst [vmem:[%s3154_s15 + $0xb0] sm:$0xff] %v1943_v58  ;;  %v2335_v61 = vadd.f32 %v2334_v59, %v2333_v42 }
 0x473   : > { %v2336_v62 = vpop.f32.mrf.mxu0 }
 0x474   : > { %v1946_v63 = vadd.f32 %v2335_v61, %v3151_v44 }
 0x475   : > { %v2337_v0 = vpop.f32.mrf.mxu0 }
 0x476   : > { %2004 = vst [vmem:[%s3154_s15 + $0xb8] sm:$0xff] %v1946_v63  ;;  %v2338_v1 = vadd.f32 %v2337_v0, %v2336_v62 }
 0x477   : > { %v2339_v2 = vpop.f32.mrf.mxu0 }
 0x478   : > { %v1951_v3 = vadd.f32 %v2338_v1, %v3151_v44 }
 0x479   : > { %v2340_v4 = vpop.f32.mrf.mxu0 }
 0x47a   : > { %2005 = vst [vmem:[%s3154_s15 + $0xc0] sm:$0xff] %v1951_v3  ;;  %v2341_v6 = vadd.f32 %v2340_v4, %v2339_v2 }
 0x47b   : > { %v2342_v7 = vpop.f32.mrf.mxu0 }
 0x47c   : > { %v1954_v8 = vadd.f32 %v2341_v6, %v3151_v44 }
 0x47d   : > { %v2343_v9 = vpop.f32.mrf.mxu0 }
 0x47e   : > { %2006 = vst [vmem:[%s3154_s15 + $0xc8] sm:$0xff] %v1954_v8  ;;  %v2344_v60 = vadd.f32 %v2343_v9, %v2342_v7 }
 0x47f   : > { %v2345_v10 = vpop.f32.mrf.mxu0 }
 0x480   : > { %v1959_v11 = vadd.f32 %v2344_v60, %v3151_v44 }
 0x481   : > { %v2346_v5 = vpop.f32.mrf.mxu0 }
 0x482   : > { %2007 = vst [vmem:[%s3154_s15 + $0xd0] sm:$0xff] %v1959_v11  ;;  %v2347_v12 = vadd.f32 %v2346_v5, %v2345_v10 }
 0x483   : > { %v2348_v13 = vpop.f32.mrf.mxu0 }
 0x484   : > { %v1962_v14 = vadd.f32 %v2347_v12, %v3151_v44 }
 0x485   : > { %v2349_v16 = vpop.f32.mrf.mxu0 }
 0x486   : > { %2008 = vst [vmem:[%s3154_s15 + $0xd8] sm:$0xff] %v1962_v14  ;;  %v2350_v17 = vadd.f32 %v2349_v16, %v2348_v13 }
 0x487   : > { %v2351_v18 = vpop.f32.mrf.mxu0 }
 0x488   : > { %v1967_v19 = vadd.f32 %v2350_v17, %v3151_v44 }
 0x489   : > { %v2352_v20 = vpop.f32.mrf.mxu0 }
 0x48a   : > { %2009 = vst [vmem:[%s3154_s15 + $0xe0] sm:$0xff] %v1967_v19  ;;  %v2353_v21 = vadd.f32 %v2352_v20, %v2351_v18 }
 0x48b   : > { %v2354_v22 = vpop.f32.mrf.mxu0 }
 0x48c   : > { %v1970_v23 = vadd.f32 %v2353_v21, %v3151_v44 }
 0x48d   : > { %v2355_v25 = vpop.f32.mrf.mxu0 }
 0x48e   : > { %2010 = vst [vmem:[%s3154_s15 + $0xe8] sm:$0xff] %v1970_v23  ;;  %v2356_v15 = vadd.f32 %v2355_v25, %v2354_v22 }
 0x48f   : > { %v2357_v24 = vpop.f32.mrf.mxu0 }
 0x490   : > { %v1975_v26 = vadd.f32 %v2356_v15, %v3151_v44 }
 0x491   : > { %v2358_v27 = vpop.f32.mrf.mxu0 }
 0x492   : > { %2011 = vst [vmem:[%s3154_s15 + $0xf0] sm:$0xff] %v1975_v26  ;;  %v2359_v28 = vadd.f32 %v2358_v27, %v2357_v24 }
 0x494   : > { %v1978_v29 = vadd.f32 %v2359_v28, %v3151_v44 }
 0x496   : > { %2012 = vst [vmem:[%s3154_s15 + $0xf8] sm:$0xff] %v1978_v29 }
 0x497   : > { %2574 = shalt.err (!%p2571_p3)
}
 0x498   : > { %s2575_s30 = scalar_lea.hbm %s3222_s29, 4096  ;;  %s2579_s25 = scalar_lea.hbm %s3281_s11, 8192 }
 0x499   : > { %p2576_p4 = scmp.ne.s32.totalorder %s3222_s29, %s2575_s30  ;;  %p2580_p9 = scmp.lt.s32.totalorder %s3222_s29, %s3281_s11 }
 0x49a   : > { %p2581_p10 = scmp.lt.s32.totalorder %s2579_s25, %s2575_s30 }
 0x49b   : > { %p2577_p7 = pnand %p2576_p4, %p2725_p5 }
 0x49c   : > { %p2582_p11 = por %p2581_p10, %p2580_p9 }
 0x49d   : > { %p2578_p8 = pneg %p2577_p7 }
 0x49f   : > { %p2583_p12 = pnand %p2582_p11, %p2578_p8 }
 0x4a1   : > { %2586 = shalt.err (!%p2583_p12)
}
 0x4a2   : > { %s2625_s21 = smov 128   ;;  %s2626_s14 = smov 8  }
 0x4a3   : > { %2472 = dma.vmem_to_hbm [thread:$0]  (%p2725_p5), %s3224_s22, 4096, %s3222_s29, %s3230_s12, %s2625_s21, %s2625_s21, %s2626_s14  }
 0x4a4 PF: > { %p2478_p13 = scmp.ge.s32.totalorder %s2621_s20, 2  ;;  %s2042_s16 = sand.u32 1, %s2609_s17  }
 0x4a5   : > { %s2043_s0 = scalar_lea.sflag [#allocation3], %s2042_s16 }
 0x4a6   : > { %p2475_p0 = pnand %p2478_p13, %p2729_p6 }
 0x4a8   : > { %p2476_p1 = pneg %p2475_p0 }
 0x4aa   : > { %2604 = dma.done.wait (%p2476_p1), %s2043_s0, 4096  }
 0x4ab   : > { %2606 = vsyncadd (%p2476_p1), %s2043_s0, 4294963200  ;;  %p21_p2 = scmp.ge.s32.totalorder %s2712_s23, 4   ;;  %s3286_s17 = smov %s2613_s18 }
 0x4ac   : > { %s3287_s18 = smov %s2617_s19  ;;  %s3288_s19 = smov %s2723_s26 }
 0x4ad   : > { %s3289_s20 = smov %s2712_s23  ;;  %23 = sbr.rel (!%p21_p2) target bundleno = 5 (0x5), region = 99 }
 0x4b2   :  { %2048 = vsyncpa [#allocation3], 1 }
 0x4b3   :  { %2050 = vsyncpa [#allocation3 + $0x1], 1 }

</bundles_post_ra>
